<compile_context>
chip_gen: v7x
topology: tpu7x:2x2x1
jax: 0.10.0
libtpu: 0.0.40
codegen_flags: <defaults>
</compile_context>

<pallas_src>
import jax
import jax.numpy as jnp
from jax import lax
from jax.experimental import pallas as pl
from jax.experimental.pallas import tpu as pltpu

N_INPUTS = 16
N_HIDDEN1 = 200
N_HIDDEN2 = 50
N_OUTPUTS = 1

_LANE = 128
# Contract the last dim of both operands: (O, K) . (B, K) -> (O, B)   (q @ k^T pattern)
_NT_DIMS = (((1,), (1,)), ((), ()))


def _round_up(n, m):
    return ((n + m - 1) // m) * m


def regression_kernel(x_ref, w1_ref, b1_ref, w2_ref, b2_ref, w3_ref, b3_ref, o_ref):
    # x_ref: (tb, N_INPUTS) f32, native PyTorch row-major layout (no wrapper transpose).
    # Weights are PyTorch-native (out_features, in_features), pre-cast to bf16;
    # biases stay f32 with shape (out_features, 1) so they broadcast across lanes.
    # All activations are produced batch-on-lanes, i.e. (out_features, tb).
    x = x_ref[...].astype(jnp.bfloat16)                              # (tb, 16)

    # hidden1: (200,16) . (tb,16)^T -> (200, tb); the rhs transpose rides the MXU/XLU path.
    h1 = lax.dot_general(w1_ref[...], x, _NT_DIMS,
                         preferred_element_type=jnp.float32) + b1_ref[...]
    h1 = jnp.maximum(h1, 0.0).astype(jnp.bfloat16)                   # relu; dropout(p=0) == id

    # hidden2: (50,200) @ (200,tb) -> (50, tb)
    h2 = jnp.dot(w2_ref[...], h1, preferred_element_type=jnp.float32) + b2_ref[...]
    h2 = jnp.maximum(h2, 0.0).astype(jnp.bfloat16)                   # relu; dropout(p=0) == id

    # out: (1,50) @ (50,tb) -> (1, tb), lane-dense store
    o_ref[...] = (jnp.dot(w3_ref[...], h2, preferred_element_type=jnp.float32)
                  + b3_ref[...]).astype(o_ref.dtype)


def _xla_forward(x, p):
    """Plain-XLA f32 forward (used for tiny batches and as the numerical reference)."""
    h1 = jnp.maximum(x @ p["w1"].T + p["b1"].T, 0.0)
    h2 = jnp.maximum(h1 @ p["w2"].T + p["b2"].T, 0.0)
    return h2 @ p["w3"].T + p["b3"].T


def _tile_and_vmem_limit():
    """Generation-aware (max batch tile, scoped-VMEM limit)."""
    vmem_cap = None
    try:
        vmem_cap = int(getattr(pltpu.get_tpu_info(), "vmem_capacity_bytes"))
    except Exception:
        vmem_cap = None
    if vmem_cap is not None and vmem_cap >= 100 * 1024 * 1024:
        # v5e / v6e: 128 MiB physical VMEM -> big tiles amortize per-step overhead.
        return 32768, 96 * 1024 * 1024
    # v7x (64 MiB physical per TC) or unknown: stay conservative.
    return 16384, 48 * 1024 * 1024


def regression_forward(x, params, *, batch_tile=None, min_pallas_batch=512):
    """x: (B, N_INPUTS) f32 (PyTorch layout).  params: PyTorch-native (out, in) f32 weights.

    Returns (B, N_OUTPUTS) f32.
    """
    x = jnp.asarray(x, jnp.float32)
    B = x.shape[0]

    # Tiny batches: a couple of microseconds of compute -- skip pallas launch overhead.
    if batch_tile is None and B < min_pallas_batch:
        return _xla_forward(x, params)

    max_tb, vmem_limit = _tile_and_vmem_limit()

    if batch_tile is not None:
        tb = min(_round_up(max(int(batch_tile), 1), _LANE), max_tb)
    else:
        b_lanes = _round_up(B, _LANE)
        if b_lanes > max_tb:
            tb = max_tb
        elif b_lanes >= 2 * 512:
            # Keep >= 2 tiles so the "parallel" batch axis feeds both TensorCores on v7x.
            tb = _round_up(-(-b_lanes // 2), 512)
        else:
            tb = b_lanes
    tb = max(min(tb, max(_round_up(B, _LANE), _LANE)), _LANE)

    n_tiles = pl.cdiv(B, tb)
    Bp = n_tiles * tb        # output is allocated padded; the tail is sliced off below.

    # Weights resident in VMEM; matmul operands in bf16 (f32 accumulation on the MXU).
    w1 = params["w1"].astype(jnp.bfloat16)
    w2 = params["w2"].astype(jnp.bfloat16)
    w3 = params["w3"].astype(jnp.bfloat16)
    b1, b2, b3 = params["b1"], params["b2"], params["b3"]          # f32 (out, 1)

    def resident(arr):  # whole-array block, constant block index -> stays resident
        return pl.BlockSpec(arr.shape, lambda i: (0, 0))

    weight_bytes = sum(int(a.size) * a.dtype.itemsize for a in (w1, b1, w2, b2, w3, b3))
    cost = pl.CostEstimate(
        flops=2 * Bp * (N_INPUTS * N_HIDDEN1 + N_HIDDEN1 * N_HIDDEN2 + N_HIDDEN2 * N_OUTPUTS),
        transcendentals=0,
        bytes_accessed=B * N_INPUTS * 4 + Bp * N_OUTPUTS * 4 + weight_bytes,
    )

    out_t = pl.pallas_call(
        regression_kernel,
        out_shape=jax.ShapeDtypeStruct((N_OUTPUTS, Bp), jnp.float32),
        grid_spec=pltpu.PrefetchScalarGridSpec(
            num_scalar_prefetch=0,
            grid=(n_tiles,),
            in_specs=[
                pl.BlockSpec((tb, N_INPUTS), lambda i: (i, 0)),    # native (B,16) rows
                resident(w1), resident(b1),
                resident(w2), resident(b2),
                resident(w3), resident(b3),
            ],
            out_specs=pl.BlockSpec((N_OUTPUTS, tb), lambda i: (0, i)),  # lane-dense output
        ),
        compiler_params=pltpu.CompilerParams(
            dimension_semantics=("parallel",),       # batch tiles shard across TCs on v7x
            vmem_limit_bytes=vmem_limit,
        ),
        cost_estimate=cost,
    )(x, w1, b1, w2, b2, w3, b3)

    return out_t[:, :B].T                            # back to (B, N_OUTPUTS)


def init_params(key):
    """Deterministic synthetic weights in PyTorch-native (out_features, in_features) layout."""
    ks = jax.random.split(key, 6)
    scale = lambda fan_in: 1.0 / jnp.sqrt(fan_in)
    w1 = jax.random.uniform(ks[0], (N_HIDDEN1, N_INPUTS), jnp.float32,
                            -scale(N_INPUTS), scale(N_INPUTS))
    b1 = jax.random.uniform(ks[1], (N_HIDDEN1, 1), jnp.float32,
                            -scale(N_INPUTS), scale(N_INPUTS))
    w2 = jax.random.uniform(ks[2], (N_HIDDEN2, N_HIDDEN1), jnp.float32,
                            -scale(N_HIDDEN1), scale(N_HIDDEN1))
    b2 = jax.random.uniform(ks[3], (N_HIDDEN2, 1), jnp.float32,
                            -scale(N_HIDDEN1), scale(N_HIDDEN1))
    w3 = jax.random.uniform(ks[4], (N_OUTPUTS, N_HIDDEN2), jnp.float32,
                            -scale(N_HIDDEN2), scale(N_HIDDEN2))
    b3 = jax.random.uniform(ks[5], (N_OUTPUTS, 1), jnp.float32,
                            -scale(N_HIDDEN2), scale(N_HIDDEN2))
    return dict(w1=w1, b1=b1, w2=w2, b2=b2, w3=w3, b3=b3)


if __name__ == "__main__":
    key = jax.random.PRNGKey(0)
    kp, k1, k2, k3 = jax.random.split(key, 4)
    params = init_params(kp)

    # 1) Tiny batch -> plain-XLA fast path (exact f32 semantics).
    x_small = jax.random.normal(k1, (8, N_INPUTS), jnp.float32)
    out_small = jax.block_until_ready(regression_forward(x_small, params))
    ref_small = _xla_forward(x_small, params)
    assert out_small.shape == (8, N_OUTPUTS)
    assert jnp.allclose(out_small, ref_small, atol=1e-5, rtol=1e-5)

    # 2) Pallas path, auto tiling: 2 "parallel" tiles of 1024, divisible batch.
    B = 2048
    x_med = jax.random.normal(k2, (B, N_INPUTS), jnp.float32)
    out_med = jax.block_until_ready(regression_forward(x_med, params))
    ref_med = _xla_forward(x_med, params)
    assert out_med.shape == (B, N_OUTPUTS)
    assert jnp.allclose(out_med, ref_med, atol=5e-2, rtol=5e-2)   # bf16 intermediates

    # 3) Pallas path, ragged batch + explicit tile: 3 tiles of 128, last tile partial.
    B2 = 300
    x_rag = jax.random.normal(k3, (B2, N_INPUTS), jnp.float32)
    out_rag = jax.block_until_ready(
        regression_forward(x_rag, params, batch_tile=128, min_pallas_batch=0))
    ref_rag = _xla_forward(x_rag, params)
    assert out_rag.shape == (B2, N_OUTPUTS)
    assert jnp.allclose(out_rag, ref_rag, atol=5e-2, rtol=5e-2)

    print("KERNEL_OK")
</pallas_src>

<mosaic_0001>
module attributes {stable_mosaic.version = 11 : i64} {
  func.func @regression_kernel(%arg0: i32, %arg1: memref<1024x16xf32, #tpu.memory_space<vmem>>, %arg2: memref<200x16xbf16, #tpu.memory_space<vmem>>, %arg3: memref<200x1xf32, #tpu.memory_space<vmem>>, %arg4: memref<50x200xbf16, #tpu.memory_space<vmem>>, %arg5: memref<50x1xf32, #tpu.memory_space<vmem>>, %arg6: memref<1x50xbf16, #tpu.memory_space<vmem>>, %arg7: memref<1x1xf32, #tpu.memory_space<vmem>>, %arg8: memref<1x1024xf32, #tpu.memory_space<vmem>>) attributes {dimension_semantics = [#tpu.dimension_semantics<parallel>], iteration_bounds = array<i64: 2>, scalar_prefetch = 0 : i64, scratch_operands = 0 : i64, tpu.core_type = #tpu.core_type<tc>, window_params = [{transform_indices = @transform_0, window_bounds = array<i64: 1024, 16>}, {pipeline_mode = #tpu.pipeline_mode<synchronous>, transform_indices = @transform_1, window_bounds = array<i64: 200, 16>}, {pipeline_mode = #tpu.pipeline_mode<synchronous>, transform_indices = @transform_2, window_bounds = array<i64: 200, 1>}, {pipeline_mode = #tpu.pipeline_mode<synchronous>, transform_indices = @transform_3, window_bounds = array<i64: 50, 200>}, {pipeline_mode = #tpu.pipeline_mode<synchronous>, transform_indices = @transform_4, window_bounds = array<i64: 50, 1>}, {pipeline_mode = #tpu.pipeline_mode<synchronous>, transform_indices = @transform_5, window_bounds = array<i64: 1, 50>}, {pipeline_mode = #tpu.pipeline_mode<synchronous>, transform_indices = @transform_6, window_bounds = array<i64: 1, 1>}, {transform_indices = @transform_7, window_bounds = array<i64: 1, 1024>}]} {
    %c0 = arith.constant 0 : index
    %c0_0 = arith.constant 0 : index
    %0 = vector.load %arg1[%c0, %c0_0] : memref<1024x16xf32, #tpu.memory_space<vmem>>, vector<1024x16xf32>
    %1 = arith.truncf %0 : vector<1024x16xf32> to vector<1024x16xbf16>
    %c0_1 = arith.constant 0 : index
    %c0_2 = arith.constant 0 : index
    %2 = vector.load %arg2[%c0_1, %c0_2] : memref<200x16xbf16, #tpu.memory_space<vmem>>, vector<200x16xbf16>
    %cst = arith.constant dense<0.000000e+00> : vector<200x1024xf32>
    %3 = tpu.matmul %2, %1, %cst {dimension_numbers = #tpu.dot_dimension_numbers<[1], [1], [0], [0], [0, 0, 1, 0], [], []>} : vector<200x16xbf16>, vector<1024x16xbf16>, vector<200x1024xf32> -> vector<200x1024xf32>
    %c0_3 = arith.constant 0 : index
    %c0_4 = arith.constant 0 : index
    %4 = vector.load %arg3[%c0_3, %c0_4] : memref<200x1xf32, #tpu.memory_space<vmem>>, vector<200x1xf32>
    %5 = vector.broadcast %4 : vector<200x1xf32> to vector<200x1024xf32>
    %6 = arith.addf %3, %5 : vector<200x1024xf32>
    %cst_5 = arith.constant 0.000000e+00 : f32
    %7 = vector.broadcast %cst_5 : f32 to vector<200x1024xf32>
    %8 = arith.maximumf %6, %7 : vector<200x1024xf32>
    %9 = arith.truncf %8 : vector<200x1024xf32> to vector<200x1024xbf16>
    %c0_6 = arith.constant 0 : index
    %c0_7 = arith.constant 0 : index
    %10 = vector.load %arg4[%c0_6, %c0_7] : memref<50x200xbf16, #tpu.memory_space<vmem>>, vector<50x200xbf16>
    %cst_8 = arith.constant dense<0.000000e+00> : vector<50x1024xf32>
    %11 = tpu.matmul %10, %9, %cst_8 {dimension_numbers = #tpu.dot_dimension_numbers<[1], [0], [0], [1], [0, 0, 1, 1], [], []>} : vector<50x200xbf16>, vector<200x1024xbf16>, vector<50x1024xf32> -> vector<50x1024xf32>
    %c0_9 = arith.constant 0 : index
    %c0_10 = arith.constant 0 : index
    %12 = vector.load %arg5[%c0_9, %c0_10] : memref<50x1xf32, #tpu.memory_space<vmem>>, vector<50x1xf32>
    %13 = vector.broadcast %12 : vector<50x1xf32> to vector<50x1024xf32>
    %14 = arith.addf %11, %13 : vector<50x1024xf32>
    %cst_11 = arith.constant 0.000000e+00 : f32
    %15 = vector.broadcast %cst_11 : f32 to vector<50x1024xf32>
    %16 = arith.maximumf %14, %15 : vector<50x1024xf32>
    %17 = arith.truncf %16 : vector<50x1024xf32> to vector<50x1024xbf16>
    %c0_12 = arith.constant 0 : index
    %c0_13 = arith.constant 0 : index
    %18 = vector.load %arg6[%c0_12, %c0_13] : memref<1x50xbf16, #tpu.memory_space<vmem>>, vector<1x50xbf16>
    %cst_14 = arith.constant dense<0.000000e+00> : vector<1x1024xf32>
    %19 = tpu.matmul %18, %17, %cst_14 {dimension_numbers = #tpu.dot_dimension_numbers<[1], [0], [0], [1], [0, 0, 1, 1], [], []>} : vector<1x50xbf16>, vector<50x1024xbf16>, vector<1x1024xf32> -> vector<1x1024xf32>
    %c0_15 = arith.constant 0 : index
    %c0_16 = arith.constant 0 : index
    %20 = vector.load %arg7[%c0_15, %c0_16] : memref<1x1xf32, #tpu.memory_space<vmem>>, vector<1x1xf32>
    %21 = vector.broadcast %20 : vector<1x1xf32> to vector<1x1024xf32>
    %22 = arith.addf %19, %21 : vector<1x1024xf32>
    %c0_17 = arith.constant 0 : index
    %c0_18 = arith.constant 0 : index
    %23 = vector.load %arg8[%c0_17, %c0_18] : memref<1x1024xf32, #tpu.memory_space<vmem>>, vector<1x1024xf32>
    tpu.vector_store %arg8[%c0_17, %c0_18], %22 {strides = array<i32>} : memref<1x1024xf32, #tpu.memory_space<vmem>>, vector<1x1024xf32>,
    return
  }
  func.func @transform_0(%arg0: i32) -> (i32, i32) {
    %c0_i32 = arith.constant 0 : i32
    %c0_i32_0 = arith.constant 0 : i32
    return %arg0, %c0_i32 : i32, i32
  }
  func.func @transform_1(%arg0: i32) -> (i32, i32) {
    %c0_i32 = arith.constant 0 : i32
    %c0_i32_0 = arith.constant 0 : i32
    %c0_i32_1 = arith.constant 0 : i32
    return %c0_i32, %c0_i32_0 : i32, i32
  }
  func.func @transform_2(%arg0: i32) -> (i32, i32) {
    %c0_i32 = arith.constant 0 : i32
    %c0_i32_0 = arith.constant 0 : i32
    %c0_i32_1 = arith.constant 0 : i32
    return %c0_i32, %c0_i32_0 : i32, i32
  }
  func.func @transform_3(%arg0: i32) -> (i32, i32) {
    %c0_i32 = arith.constant 0 : i32
    %c0_i32_0 = arith.constant 0 : i32
    %c0_i32_1 = arith.constant 0 : i32
    return %c0_i32, %c0_i32_0 : i32, i32
  }
  func.func @transform_4(%arg0: i32) -> (i32, i32) {
    %c0_i32 = arith.constant 0 : i32
    %c0_i32_0 = arith.constant 0 : i32
    %c0_i32_1 = arith.constant 0 : i32
    return %c0_i32, %c0_i32_0 : i32, i32
  }
  func.func @transform_5(%arg0: i32) -> (i32, i32) {
    %c0_i32 = arith.constant 0 : i32
    %c0_i32_0 = arith.constant 0 : i32
    %c0_i32_1 = arith.constant 0 : i32
    return %c0_i32, %c0_i32_0 : i32, i32
  }
  func.func @transform_6(%arg0: i32) -> (i32, i32) {
    %c0_i32 = arith.constant 0 : i32
    %c0_i32_0 = arith.constant 0 : i32
    %c0_i32_1 = arith.constant 0 : i32
    return %c0_i32, %c0_i32_0 : i32, i32
  }
  func.func @transform_7(%arg0: i32) -> (i32, i32) {
    %c0_i32 = arith.constant 0 : i32
    %c0_i32_0 = arith.constant 0 : i32
    return %c0_i32, %arg0 : i32, i32
  }
}

</mosaic_0001>

<bundles_post_ra>
// kernel: tpu_custom_call.1
= control target key start
LH: loop header
LB: loop body
LE: loop exit
PB: predicated region body
PF: predicated region fallthrough
CT: control target
= control target key end

     0   :  { %s4273_s0 = inlined_call_operand.vmem [shape: f32[2048,16], index: 0, kind: input, shape index: {}]   ;;  %s4274_s1 = inlined_call_operand.vmem [shape: bf16[200,16], index: 1, kind: input, shape index: {}]   ;;  %s4275_s2 = inlined_call_operand.vmem [shape: f32[200,1], index: 2, kind: input, shape index: {}]   ;;  %s4276_s3 = inlined_call_operand.vmem [shape: bf16[50,200], index: 3, kind: input, shape index: {}]   ;;  %s4277_s4 = inlined_call_operand.vmem [shape: f32[50,1], index: 4, kind: input, shape index: {}]   ;;  %s4278_s5 = inlined_call_operand.vmem [shape: bf16[1,50], index: 5, kind: input, shape index: {}]   ;;  %s4279_s6 = inlined_call_operand.<no memory space> [shape: f32[1,1], index: 6, kind: input, shape index: {}]   ;;  %s4280_s7 = inlined_call_operand.hbm [shape: f32[1,2048], index: 7, kind: output, shape index: {}]  }
   0x1   :  { %v12_v0 = vstv %s4279_s6 }
   0x2   :  { %13 = vst [vmem:[#allocation2] sm:$0x1] %v12_v0 }
   0x3   :  { %14 = vsyncpa [#allocation4], 0 }
   0x4   :  { %16 = vsyncpa [#allocation4 + $0x1], 0  ;;  %s3214_s26 = smov 0   ;;  %s3216_s27 = smov 0  }
   0x5   :  { %s3218_s28 = smov 0   ;;  %s3220_s29 = smov 0  }
   0x6 LB: > { %s2721_s6 = sadd.s32 4294967295, %s3166_s29   ;;  %s2722_s30 = sadd.s32 4294967294, %s3166_s29   ;;  %s3166_s29 = sphi %s3220_s29, %s4286_s29   ;;  %s3162_s28 = sphi %s3218_s28, %s4285_s28   ;;  %s3158_s27 = sphi %s3216_s27, %s4284_s27   ;;  %s3154_s26 = sphi %s3214_s26, %s4283_s26  }
   0x7   : > { %s3237_s8 = sadd.s32 1, %s3166_s29   ;;  %s181_s9 = sadd.s32 1, %s3162_s28 }
   0x8   : > { %s178_s10 = ssub.s32 %s3166_s29, %s3237_s8  ;;  %p191_p0 = scmp.ne.s32.totalorder %s3162_s28, %s3158_s27 }
   0x9   : > { %p179_p1 = scmp.eq.s32.totalorder %s178_s10, 0  ;;  %p192_p2 = scmp.eq.s32.totalorder %s2721_s6, 1 }
   0xa   : > { %p197_p3 = scmp.ne.s32.totalorder %s3158_s27, %s3154_s26  ;;  %p198_p4 = scmp.eq.s32.totalorder %s2722_s30, 1 }
   0xb   : > { %s3247_s11 = scalar_select %p179_p1, %s3162_s28, %s181_s9  }
   0xc   : > { %p3249_p5 = por %p192_p2, %p191_p0  ;;  %p3253_p6 = por %p198_p4, %p197_p3 }
   0xd   : > { %p2725_p7 = scmp.ge.s32.totalorder %s3166_s29, 1  ;;  %p243_p8 = scmp.lt.s32.totalorder %s3166_s29, 3 }
   0xf   : > { %p244_p9 = pnand %p2725_p7, %p243_p8 }
  0x10   : > { %s3259_s14 = sshll.u32 (!%p244_p9), %s2721_s6, 7  ;;  %v3265_v1 = vld [vmem:[%s4274_s1] sm:$0xff] (!%p244_p9)   ;;  %vm713_vm0 = vcmask (!%p244_p9), 130048   ;;  %v3168_v30 = vmov (!%p244_p9), 0   ;;  %vm1975_vm1 = vcmask (!%p244_p9), 588800   ;;  %vm1988_vm2 = vcmask (!%p244_p9), 1043456  }
  0x11   : > { %247 = sbr.rel (%p244_p9) target bundleno = 1007 (0x3ef), region = 48  ;;  %p276_p10 = scmp.lt.s32.totalorder (!%p244_p9), %s3259_s14, 255  ;;  %2852 = vmatprep.mubr.msk.bf16.mxu0 (!%p244_p9), %vm713_vm0, %v3265_v1  ;;  %2894 = vmatprep.mubr.msk.bf16.mxu1 (!%p244_p9), %vm713_vm0, %v3265_v1  ;;  %vm2400_vm3 = vcmask (!%p244_p9), 1040384   ;;  %vm2396_vm4 = vcmask (!%p244_p9), 408576  }
  0x12   : > { %3077 = vset.pattern.permute.xlu0 (!%p244_p9), %v3168_v30  ;;  %3078 = vset.pattern.permute.xlu1 (!%p244_p9), %v3168_v30  ;;  %s272_s9 = sand.u32 (!%p244_p9), 1, %s3158_s27   ;;  %s3170_s22 = smov (!%p244_p9), [#allocation3]  }
  0x13   : > { %s2726_s10 = sshll.u32 (!%p244_p9), %s272_s9, 3  ;;  %s2649_s19 = scalar_lea.sflag (!%p244_p9), [#allocation4], %s272_s9 }
  0x14   : > { %s274_s15 = scalar_lea.vmem (!%p244_p9), [#allocation3], %s2726_s10  ;;  %s3108_s23 = sshll.u32 (!%p244_p9), %s3170_s22, 4  ;;  %s3109_s23 = int_to_ptr.vmem [resolvable:$false] %s3108_s23 }
  0x15   : > { %s2663_s16 = sshll.u32 (!%p244_p9), %s274_s15, 4  ;;  %s3110_s24 = scalar_lea.vmem (!%p244_p9), %s3109_s23, 256  ;;  %s4233_s16 = int_to_ptr.vmem [resolvable:$true] %s2663_s16 }
  0x16   : > { %s3104_s20 = scalar_lea.vmem (!%p244_p9), %s4233_s16, 128  ;;  %p3111_p0 = scmp.lt.s32.totalorder (!%p244_p9), %s4233_s16, %s3109_s23 }
  0x17   : > { %p3105_p11 = scmp.ne.s32.totalorder (!%p244_p9), %s4233_s16, %s3104_s20  ;;  %p3112_p1 = scmp.lt.s32.totalorder (!%p244_p9), %s3110_s24, %s3104_s20 }
  0x18   : > { %s277_s17 = scalar_select %p276_p10, %s3259_s14, 255 }
  0x19   : > { %p3106_p12 = pnand %p3105_p11, %p3249_p5  ;;  %p3113_p2 = por %p3112_p1, %p3111_p0 }
  0x1a   : > { %s2728_s18 = sshll.u32 %s277_s17, 3 }
  0x1b   : > { %s3275_s21 = scalar_lea.vmem %s4273_s0, %s2728_s18  ;;  %s4231_s18 = scalar_lea.hbm %s4280_s7, %s3259_s14 }
  0x1c   : > { %v299_v2 = vld [vmem:[%s3275_s21 + $0x80] sm:$0xff]  ;;  %v300_v3 = vld [vmem:[%s3275_s21 + $0x88] sm:$0xff]  ;;  %v301_v13 = vld [vmem:[%s3275_s21 + $0x90] sm:$0xff]  ;;  %p3107_p13 = pneg %p3106_p12 }
  0x1d   : > { %v331_v4 = vld [vmem:[%s3275_s21 + $0x180] sm:$0xff]  ;;  %v419_v5 = vpack.c.bf16 %v300_v3, %v299_v2  ;;  %v332_v6 = vld [vmem:[%s3275_s21 + $0x188] sm:$0xff]  ;;  %v302_v15 = vld [vmem:[%s3275_s21 + $0x98] sm:$0xff] }
  0x1e   : > { %v283_v7 = vld [vmem:[%s3275_s21] sm:$0xff]  ;;  %v284_v8 = vld [vmem:[%s3275_s21 + $0x8] sm:$0xff]  ;;  %v435_v9 = vpack.c.bf16 %v332_v6, %v331_v4  ;;  %v333_v16 = vld [vmem:[%s3275_s21 + $0x190] sm:$0xff]  ;;  %v420_v19 = vpack.c.bf16 %v302_v15, %v301_v13  ;;  %p3114_p3 = pnand %p3113_p2, %p3107_p13 }
  0x1f   : > { %v411_v10 = vpack.c.bf16 %v284_v8, %v283_v7  ;;  %v315_v11 = vld [vmem:[%s3275_s21 + $0x100] sm:$0xff]  ;;  %v316_v12 = vld [vmem:[%s3275_s21 + $0x108] sm:$0xff]  ;;  %3004 = vmatprep.subr.msk.bf16.mxu0 %vm713_vm0, %v419_v5  ;;  %v334_v17 = vld [vmem:[%s3275_s21 + $0x198] sm:$0xff] }
  0x20   : > { %v427_v14 = vpack.c.bf16 %v316_v12, %v315_v11  ;;  %3012 = vmatprep.subr.msk.bf16.mxu1 %vm713_vm0, %v435_v9  ;;  %v436_v20 = vpack.c.bf16 %v334_v17, %v333_v16  ;;  %v285_v21 = vld [vmem:[%s3275_s21 + $0x10] sm:$0xff]  ;;  %v286_v22 = vld [vmem:[%s3275_s21 + $0x18] sm:$0xff]  ;;  %v303_v28 = vld [vmem:[%s3275_s21 + $0xa0] sm:$0xff] }
  0x21   : > { %v754_v18 = vsel %vm713_vm0, %v411_v10, 0  ;;  %v317_v23 = vld [vmem:[%s3275_s21 + $0x110] sm:$0xff]  ;;  %v318_v25 = vld [vmem:[%s3275_s21 + $0x118] sm:$0xff]  ;;  %v412_v26 = vpack.c.bf16 %v286_v22, %v285_v21  ;;  %v304_v29 = vld [vmem:[%s3275_s21 + $0xa8] sm:$0xff] }
  0x22   : > { %2837 = vmatpush3.bf16.xpose.msra.mxu0 %v754_v18  ;;  %v802_v24 = vsel %vm713_vm0, %v427_v14, 0  ;;  %v428_v27 = vpack.c.bf16 %v318_v25, %v317_v23  ;;  %v335_v31 = vld [vmem:[%s3275_s21 + $0x1a0] sm:$0xff]  ;;  %v336_v32 = vld [vmem:[%s3275_s21 + $0x1a8] sm:$0xff]  ;;  %v421_v34 = vpack.c.bf16 %v304_v29, %v303_v28  ;;  %v305_v43 = vld [vmem:[%s3275_s21 + $0xb0] sm:$0xff] }
  0x23   : > { %2879 = vmatpush3.bf16.xpose.msra.mxu1 %v802_v24  ;;  %3005 = vmatprep.subr.msk.bf16.mxu0 %vm713_vm0, %v420_v19  ;;  %v757_v33 = vsel %vm713_vm0, %v412_v26, 0  ;;  %v437_v36 = vpack.c.bf16 %v336_v32, %v335_v31  ;;  %v287_v37 = vld [vmem:[%s3275_s21 + $0x20] sm:$0xff]  ;;  %v288_v38 = vld [vmem:[%s3275_s21 + $0x28] sm:$0xff]  ;;  %v306_v44 = vld [vmem:[%s3275_s21 + $0xb8] sm:$0xff] }
  0x24   : > { %3013 = vmatprep.subr.msk.bf16.mxu1 %vm713_vm0, %v436_v20  ;;  %v805_v35 = vsel %vm713_vm0, %v428_v27, 0  ;;  %v319_v39 = vld [vmem:[%s3275_s21 + $0x120] sm:$0xff]  ;;  %v320_v40 = vld [vmem:[%s3275_s21 + $0x128] sm:$0xff]  ;;  %v413_v41 = vpack.c.bf16 %v288_v38, %v287_v37  ;;  %v337_v45 = vld [vmem:[%s3275_s21 + $0x1b0] sm:$0xff]  ;;  %v422_v48 = vpack.c.bf16 %v306_v44, %v305_v43 }
  0x25   : > { %v429_v42 = vpack.c.bf16 %v320_v40, %v319_v39  ;;  %v338_v46 = vld [vmem:[%s3275_s21 + $0x1b8] sm:$0xff]  ;;  %v289_v51 = vld [vmem:[%s3275_s21 + $0x30] sm:$0xff]  ;;  %v307_v57 = vld [vmem:[%s3275_s21 + $0xc0] sm:$0xff] }
  0x26   : > { %v760_v47 = vsel %vm713_vm0, %v413_v41, 0  ;;  %v438_v50 = vpack.c.bf16 %v338_v46, %v337_v45  ;;  %v290_v52 = vld [vmem:[%s3275_s21 + $0x38] sm:$0xff]  ;;  %v321_v53 = vld [vmem:[%s3275_s21 + $0x130] sm:$0xff]  ;;  %v308_v58 = vld [vmem:[%s3275_s21 + $0xc8] sm:$0xff] }
  0x27   : > { %v808_v49 = vsel %vm713_vm0, %v429_v42, 0  ;;  %v322_v54 = vld [vmem:[%s3275_s21 + $0x138] sm:$0xff]  ;;  %v414_v55 = vpack.c.bf16 %v290_v52, %v289_v51  ;;  %v339_v59 = vld [vmem:[%s3275_s21 + $0x1c0] sm:$0xff]  ;;  %v340_v60 = vld [vmem:[%s3275_s21 + $0x1c8] sm:$0xff]  ;;  %v423_v62 = vpack.c.bf16 %v308_v58, %v307_v57 }
  0x28   : > { %v430_v56 = vpack.c.bf16 %v322_v54, %v321_v53  ;;  %v439_v0 = vpack.c.bf16 %v340_v60, %v339_v59  ;;  %v291_v2 = vld [vmem:[%s3275_s21 + $0x40] sm:$0xff]  ;;  %v292_v3 = vld [vmem:[%s3275_s21 + $0x48] sm:$0xff]  ;;  %v309_v8 = vld [vmem:[%s3275_s21 + $0xd0] sm:$0xff] }
  0x29   : > { %v763_v61 = vsel %vm713_vm0, %v414_v55, 0  ;;  %v323_v4 = vld [vmem:[%s3275_s21 + $0x140] sm:$0xff]  ;;  %v324_v5 = vld [vmem:[%s3275_s21 + $0x148] sm:$0xff]  ;;  %v415_v6 = vpack.c.bf16 %v292_v3, %v291_v2  ;;  %v310_v9 = vld [vmem:[%s3275_s21 + $0xd8] sm:$0xff] }
  0x2a   : > { %2839 = vmatpush3.bf16.xpose.msra.mxu0 %v757_v33  ;;  %v811_v63 = vsel %vm713_vm0, %v430_v56, 0  ;;  %v431_v7 = vpack.c.bf16 %v324_v5, %v323_v4  ;;  %v341_v10 = vld [vmem:[%s3275_s21 + $0x1d0] sm:$0xff]  ;;  %v342_v11 = vld [vmem:[%s3275_s21 + $0x1d8] sm:$0xff]  ;;  %v424_v13 = vpack.c.bf16 %v310_v9, %v309_v8  ;;  %v311_v21 = vld [vmem:[%s3275_s21 + $0xe0] sm:$0xff] }
  0x2b   : > { %2881 = vmatpush3.bf16.xpose.msra.mxu1 %v805_v35  ;;  %3006 = vmatprep.subr.msk.bf16.mxu0 %vm713_vm0, %v421_v34  ;;  %v766_v12 = vsel %vm713_vm0, %v415_v6, 0  ;;  %v293_v14 = vld [vmem:[%s3275_s21 + $0x50] sm:$0xff]  ;;  %v294_v15 = vld [vmem:[%s3275_s21 + $0x58] sm:$0xff]  ;;  %v440_v17 = vpack.c.bf16 %v342_v11, %v341_v10  ;;  %v500_v22 = vld [vmem:[%s4275_s2] sm:$0xff] }
  0x2c   : > { %3014 = vmatprep.subr.msk.bf16.mxu1 %vm713_vm0, %v437_v36  ;;  %v814_v16 = vsel %vm713_vm0, %v431_v7, 0  ;;  %v325_v18 = vld [vmem:[%s3275_s21 + $0x150] sm:$0xff]  ;;  %v326_v19 = vld [vmem:[%s3275_s21 + $0x158] sm:$0xff]  ;;  %v416_v20 = vpack.c.bf16 %v294_v15, %v293_v14  ;;  %v312_v24 = vld [vmem:[%s3275_s21 + $0xe8] sm:$0xff]  ;;  %527 = vperm.xlu0 %3077, %v500_v22  }
  0x2d   : > { %v432_v23 = vpack.c.bf16 %v326_v19, %v325_v18  ;;  %v343_v25 = vld [vmem:[%s3275_s21 + $0x1e0] sm:$0xff]  ;;  %v344_v26 = vld [vmem:[%s3275_s21 + $0x1e8] sm:$0xff]  ;;  %v502_v28 = vld [vmem:[%s4275_s2 + $0x10] sm:$0xff]  ;;  %v425_v31 = vpack.c.bf16 %v312_v24, %v311_v21 }
  0x2e   : > { %v501_v27 = vld [vmem:[%s4275_s2 + $0x8] sm:$0xff]  ;;  %v769_v29 = vsel %vm713_vm0, %v416_v20, 0  ;;  %v295_v32 = vld [vmem:[%s3275_s21 + $0x60] sm:$0xff]  ;;  %537 = vperm.xlu1 %3078, %v502_v28   ;;  %v441_v34 = vpack.c.bf16 %v344_v26, %v343_v25  ;;  %v313_v40 = vld [vmem:[%s3275_s21 + $0xf0] sm:$0xff] }
  0x2f   : > { %v817_v33 = vsel %vm713_vm0, %v432_v23, 0  ;;  %v296_v35 = vld [vmem:[%s3275_s21 + $0x68] sm:$0xff]  ;;  %v327_v36 = vld [vmem:[%s3275_s21 + $0x160] sm:$0xff]  ;;  %v503_v41 = vld [vmem:[%s4275_s2 + $0x18] sm:$0xff] }
  0x30   : > { %532 = vperm.xlu0 %3077, %v501_v27   ;;  %v328_v37 = vld [vmem:[%s3275_s21 + $0x168] sm:$0xff]  ;;  %v504_v38 = vld [vmem:[%s4275_s2 + $0x20] sm:$0xff]  ;;  %v417_v39 = vpack.c.bf16 %v296_v35, %v295_v32  ;;  %v314_v43 = vld [vmem:[%s3275_s21 + $0xf8] sm:$0xff] }
  0x31   : > { %v433_v42 = vpack.c.bf16 %v328_v37, %v327_v36  ;;  %v345_v44 = vld [vmem:[%s3275_s21 + $0x1f0] sm:$0xff]  ;;  %v346_v45 = vld [vmem:[%s3275_s21 + $0x1f8] sm:$0xff]  ;;  %v508_v56 = vld [vmem:[%s4275_s2 + $0x40] sm:$0xff] }
  0x32   : > { %2841 = vmatpush3.bf16.xpose.msra.mxu0 %v760_v47  ;;  %v506_v46 = vld [vmem:[%s4275_s2 + $0x30] sm:$0xff]  ;;  %542 = vperm.xlu1 %3078, %v503_v41   ;;  %v505_v47 = vld [vmem:[%s4275_s2 + $0x28] sm:$0xff]  ;;  %v442_v51 = vpack.c.bf16 %v346_v45, %v345_v44  ;;  %v298_v53 = vld [vmem:[%s3275_s21 + $0x78] sm:$0xff] }
  0x33   : > { %2883 = vmatpush3.bf16.xpose.msra.mxu1 %v808_v49  ;;  %3007 = vmatprep.subr.msk.bf16.mxu0 %vm713_vm0, %v422_v48  ;;  %v772_v48 = vsel %vm713_vm0, %v417_v39, 0  ;;  %v426_v49 = vpack.c.bf16 %v314_v43, %v313_v40  ;;  %v297_v52 = vld [vmem:[%s3275_s21 + $0x70] sm:$0xff]  ;;  %v330_v55 = vld [vmem:[%s3275_s21 + $0x178] sm:$0xff]  ;;  %v363_v60 = vld [vmem:[%s3275_s21 + $0x280] sm:$0xff] }
  0x34   : > { %3015 = vmatprep.subr.msk.bf16.mxu1 %vm713_vm0, %v438_v50  ;;  %547 = vperm.xlu0 %3077, %v504_v38   ;;  %v820_v50 = vsel %vm713_vm0, %v433_v42, 0  ;;  %v329_v54 = vld [vmem:[%s3275_s21 + $0x170] sm:$0xff]  ;;  %v507_v57 = vld [vmem:[%s4275_s2 + $0x38] sm:$0xff]  ;;  %v418_v58 = vpack.c.bf16 %v298_v53, %v297_v52  ;;  %v509_v2 = vld [vmem:[%s4275_s2 + $0x48] sm:$0xff] }
  0x35   : > { %v434_v59 = vpack.c.bf16 %v330_v55, %v329_v54  ;;  %v347_v7 = vld [vmem:[%s3275_s21 + $0x200] sm:$0xff]  ;;  %v348_v8 = vld [vmem:[%s3275_s21 + $0x208] sm:$0xff]  ;;  %v365_v15 = vld [vmem:[%s3275_s21 + $0x290] sm:$0xff] }
  0x36   : > { %552 = vperm.xlu1 %3078, %v505_v47   ;;  %v775_v3 = vsel %vm713_vm0, %v418_v58, 0  ;;  %v379_v9 = vld [vmem:[%s3275_s21 + $0x300] sm:$0xff]  ;;  %v380_v10 = vld [vmem:[%s3275_s21 + $0x308] sm:$0xff]  ;;  %v397_v18 = vld [vmem:[%s3275_s21 + $0x390] sm:$0xff] }
  0x37   : > { %v823_v5 = vsel %vm713_vm0, %v434_v59, 0  ;;  %v512_v11 = vld [vmem:[%s4275_s2 + $0x60] sm:$0xff]  ;;  %v459_v14 = vpack.c.bf16 %v380_v10, %v379_v9  ;;  %v398_v19 = vld [vmem:[%s3275_s21 + $0x398] sm:$0xff]  ;;  %v513_v20 = vld [vmem:[%s4275_s2 + $0x68] sm:$0xff] }
  0x38   : > { %557 = vperm.xlu0 %3077, %v506_v46   ;;  %v3438_v22 = vld [vmem:[%s4274_s1 + $0x8] sm:$0xff]   ;;  %v349_v25 = vld [vmem:[%s3275_s21 + $0x210] sm:$0xff]  ;;  %v350_v26 = vld [vmem:[%s3275_s21 + $0x218] sm:$0xff]  ;;  %v468_v27 = vpack.c.bf16 %v398_v19, %v397_v18 }
  0x39   : > { %v898_v23 = vsel %vm713_vm0, %v459_v14, 0  ;;  %v381_v28 = vld [vmem:[%s3275_s21 + $0x310] sm:$0xff]  ;;  %v444_v32 = vpack.c.bf16 %v350_v26, %v349_v25  ;;  %v367_v35 = vld [vmem:[%s3275_s21 + $0x2a0] sm:$0xff]  ;;  %v368_v36 = vld [vmem:[%s3275_s21 + $0x2a8] sm:$0xff] }
  0x3a   : > { %2843 = vmatpush3.bf16.xpose.msra.mxu0 %v763_v61  ;;  %v364_v61 = vld [vmem:[%s3275_s21 + $0x288] sm:$0xff]  ;;  %562 = vperm.xlu1 %3078, %v507_v57   ;;  %v399_v37 = vld [vmem:[%s3275_s21 + $0x3a0] sm:$0xff]  ;;  %v518_v39 = vld [vmem:[%s4275_s2 + $0x90] sm:$0xff]  ;;  %v453_v43 = vpack.c.bf16 %v368_v36, %v367_v35 }
  0x3b   : > { %2885 = vmatpush3.bf16.xpose.msra.mxu1 %v811_v63  ;;  %3008 = vmatprep.subr.msk.bf16.mxu0 %vm713_vm0, %v423_v62  ;;  %v395_v62 = vld [vmem:[%s3275_s21 + $0x380] sm:$0xff]  ;;  %v396_v63 = vld [vmem:[%s3275_s21 + $0x388] sm:$0xff]  ;;  %v451_v4 = vpack.c.bf16 %v364_v61, %v363_v60  ;;  %v853_v40 = vsel %vm713_vm0, %v444_v32, 0  ;;  %v3472_v41 = vld [vmem:[%s4274_s1 + $0x10] sm:$0xff]  }
  0x3c   : > { %3016 = vmatprep.subr.msk.bf16.mxu1 %vm713_vm0, %v439_v0  ;;  %567 = vperm.xlu0 %3077, %v508_v56   ;;  %v510_v0 = vld [vmem:[%s4275_s2 + $0x50] sm:$0xff]  ;;  %v467_v6 = vpack.c.bf16 %v396_v63, %v395_v62  ;;  %v400_v38 = vld [vmem:[%s3275_s21 + $0x3a8] sm:$0xff]  ;;  %v351_v45 = vld [vmem:[%s3275_s21 + $0x220] sm:$0xff] }
  0x3d   : > { %v469_v44 = vpack.c.bf16 %v400_v38, %v399_v37  ;;  %v352_v46 = vld [vmem:[%s3275_s21 + $0x228] sm:$0xff]  ;;  %v383_v47 = vld [vmem:[%s3275_s21 + $0x320] sm:$0xff]  ;;  %v3497_v52 = vld [vmem:[%s4274_s1 + $0x18] sm:$0xff]  }
  0x3e   : > { %572 = vperm.xlu1 %3078, %v509_v2   ;;  %v369_v54 = vld [vmem:[%s3275_s21 + $0x2b0] sm:$0xff]  ;;  %v370_v55 = vld [vmem:[%s3275_s21 + $0x2b8] sm:$0xff]  ;;  %v371_v9 = vld [vmem:[%s3275_s21 + $0x2c0] sm:$0xff] }
  0x3f   : > { %v401_v56 = vld [vmem:[%s3275_s21 + $0x3b0] sm:$0xff]  ;;  %v402_v57 = vld [vmem:[%s3275_s21 + $0x3b8] sm:$0xff]  ;;  %v454_v60 = vpack.c.bf16 %v370_v55, %v369_v54  ;;  %v372_v10 = vld [vmem:[%s3275_s21 + $0x2c8] sm:$0xff] }
  0x40   : > { %577 = vperm.xlu0 %3077, %v510_v0   ;;  %v522_v58 = vld [vmem:[%s4275_s2 + $0xb0] sm:$0xff]  ;;  %v470_v62 = vpack.c.bf16 %v402_v57, %v401_v56  ;;  %v354_v0 = vld [vmem:[%s3275_s21 + $0x238] sm:$0xff]  ;;  %v355_v18 = vld [vmem:[%s3275_s21 + $0x240] sm:$0xff] }
  0x41   : > { %v353_v63 = vld [vmem:[%s3275_s21 + $0x230] sm:$0xff]  ;;  %v356_v19 = vld [vmem:[%s3275_s21 + $0x248] sm:$0xff]  ;;  %v406_v32 = vld [vmem:[%s3275_s21 + $0x3d8] sm:$0xff] }
  0x42   : > { %2845 = vmatpush3.bf16.xpose.msra.mxu0 %v766_v12  ;;  %v511_v12 = vld [vmem:[%s4275_s2 + $0x58] sm:$0xff]  ;;  %v385_v2 = vld [vmem:[%s3275_s21 + $0x330] sm:$0xff]  ;;  %v447_v25 = vpack.c.bf16 %v356_v19, %v355_v18  ;;  %v3565_v26 = vld [vmem:[%s4274_s1 + $0x28] sm:$0xff]  }
  0x43   : > { %2887 = vmatpush3.bf16.xpose.msra.mxu1 %v814_v16  ;;  %3009 = vmatprep.subr.msk.bf16.mxu0 %vm713_vm0, %v424_v13  ;;  %v443_v13 = vpack.c.bf16 %v348_v8, %v347_v7  ;;  %v366_v16 = vld [vmem:[%s3275_s21 + $0x298] sm:$0xff]  ;;  %v3531_v7 = vld [vmem:[%s4274_s1 + $0x20] sm:$0xff]   ;;  %v357_v38 = vld [vmem:[%s3275_s21 + $0x250] sm:$0xff] }
  0x44   : > { %3017 = vmatprep.subr.msk.bf16.mxu1 %vm713_vm0, %v440_v17  ;;  %587 = vperm.xlu0 %3077, %v512_v11   ;;  %v514_v17 = vld [vmem:[%s4275_s2 + $0x70] sm:$0xff]  ;;  %v452_v24 = vpack.c.bf16 %v366_v16, %v365_v15  ;;  %v403_v11 = vld [vmem:[%s3275_s21 + $0x3c0] sm:$0xff]  ;;  %v455_v15 = vpack.c.bf16 %v372_v10, %v371_v9 }
  0x45   : > { %582 = vperm.xlu1 %3078, %v511_v12   ;;  %v850_v21 = vsel %vm713_vm0, %v443_v13, 0  ;;  %v404_v12 = vld [vmem:[%s3275_s21 + $0x3c8] sm:$0xff] }
  0x46   : > { %v521_v13 = vld [vmem:[%s4275_s2 + $0xa8] sm:$0xff] }
  0x48   : > { %597 = vperm.xlu0 %3077, %v514_v17   ;;  %v471_v17 = vpack.c.bf16 %v404_v12, %v403_v11 }
  0x49   : > { %592 = vperm.xlu1 %3078, %v513_v20   ;;  %v387_v20 = vld [vmem:[%s3275_s21 + $0x340] sm:$0xff] }
  0x4a   : > { %2847 = vmatpush3.bf16.xpose.msra.mxu0 %v769_v29  ;;  %v382_v29 = vld [vmem:[%s3275_s21 + $0x318] sm:$0xff] }
  0x4b   : > { %2889 = vmatpush3.bf16.xpose.msra.mxu1 %v817_v33  ;;  %3010 = vmatprep.subr.msk.bf16.mxu0 %vm713_vm0, %v425_v31  ;;  %v516_v31 = vld [vmem:[%s4275_s2 + $0x80] sm:$0xff]  ;;  %v515_v33 = vld [vmem:[%s4275_s2 + $0x78] sm:$0xff] }
  0x4c   : > { %3018 = vmatprep.subr.msk.bf16.mxu1 %vm713_vm0, %v441_v34  ;;  %v460_v34 = vpack.c.bf16 %v382_v29, %v381_v28  ;;  %607 = vperm.xlu0 %3077, %v516_v31   ;;  %v373_v28 = vld [vmem:[%s3275_s21 + $0x2d0] sm:$0xff]  ;;  %v374_v29 = vld [vmem:[%s3275_s21 + $0x2d8] sm:$0xff] }
  0x4d   : > { %602 = vperm.xlu1 %3078, %v515_v33   ;;  %v405_v31 = vld [vmem:[%s3275_s21 + $0x3d0] sm:$0xff]  ;;  %v1903_v33 = vld [vmem:[%s4277_s4 + $0x18] sm:$0xff]  ;;  %v456_v35 = vpack.c.bf16 %v374_v29, %v373_v28  ;;  %v3091_v28 = vld [vmem:[%s4274_s1 + $0x60] ss:$0 sps:$4 sm:$0xff]  }
  0x4e   : > { %v901_v42 = vsel %vm713_vm0, %v460_v34, 0  ;;  %v862_v34 = vsel %vm713_vm0, %v447_v25, 0  ;;  %v472_v37 = vpack.c.bf16 %v406_v32, %v405_v31  ;;  %v3089_v25 = vld [vmem:[%s4274_s1 + $0x50] sm:$0xff]  }
  0x50   : > { %617 = vperm.xlu0 %3077, %v518_v39   ;;  %v358_v39 = vld [vmem:[%s3275_s21 + $0x258] sm:$0xff] }
  0x52   : > { %2849 = vmatpush3.bf16.xpose.msra.mxu0 %v772_v48  ;;  %v384_v48 = vld [vmem:[%s3275_s21 + $0x328] sm:$0xff] }
  0x53   : > { %2891 = vmatpush3.bf16.xpose.msra.mxu1 %v820_v50  ;;  %3011 = vmatprep.subr.msk.bf16.mxu0 %vm713_vm0, %v426_v49  ;;  %v520_v49 = vld [vmem:[%s4275_s2 + $0xa0] sm:$0xff]  ;;  %v517_v50 = vld [vmem:[%s4275_s2 + $0x88] sm:$0xff]  ;;  %v461_v53 = vpack.c.bf16 %v384_v48, %v383_v47 }
  0x54   : > { %3019 = vmatprep.subr.msk.bf16.mxu1 %vm713_vm0, %v442_v51  ;;  %v445_v51 = vpack.c.bf16 %v352_v46, %v351_v45  ;;  %627 = vperm.xlu0 %3077, %v520_v49   ;;  %v448_v45 = vpack.c.bf16 %v358_v39, %v357_v38  ;;  %v3599_v46 = vld [vmem:[%s4274_s1 + $0x30] sm:$0xff]   ;;  %v375_v48 = vld [vmem:[%s3275_s21 + $0x2e0] sm:$0xff]  ;;  %v376_v49 = vld [vmem:[%s3275_s21 + $0x2e8] sm:$0xff] }
  0x55   : > { %612 = vperm.xlu1 %3078, %v517_v50   ;;  %v904_v61 = vsel %vm713_vm0, %v461_v53, 0  ;;  %v407_v50 = vld [vmem:[%s3275_s21 + $0x3e0] sm:$0xff]  ;;  %v1902_v53 = vld [vmem:[%s4277_s4 + $0x10] sm:$0xff]  ;;  %v457_v55 = vpack.c.bf16 %v376_v49, %v375_v48 }
  0x56   : > { %v856_v59 = vsel %vm713_vm0, %v445_v51, 0  ;;  %v408_v51 = vld [vmem:[%s3275_s21 + $0x3e8] sm:$0xff]  ;;  %v865_v54 = vsel %vm713_vm0, %v448_v45, 0 }
  0x57   : > { %v473_v57 = vpack.c.bf16 %v408_v51, %v407_v50 }
  0x58   : > { %637 = vperm.xlu0 %3077, %v522_v58   ;;  %v359_v58 = vld [vmem:[%s3275_s21 + $0x260] sm:$0xff] }
  0x5a   : > { %2851 = vmatpush3.bf16.xpose.msra.mxu0 %v775_v3  ;;  %v386_v3 = vld [vmem:[%s3275_s21 + $0x338] sm:$0xff] }
  0x5b   : > { %2893 = vmatpush3.bf16.xpose.msra.mxu1 %v823_v5  ;;  %3020 = vmatprep.subr.msk.bf16.mxu0 %vm713_vm0, %v451_v4  ;;  %v519_v4 = vld [vmem:[%s4275_s2 + $0x98] sm:$0xff]  ;;  %v524_v5 = vld [vmem:[%s4275_s2 + $0xc0] sm:$0xff]  ;;  %v462_v8 = vpack.c.bf16 %v386_v3, %v385_v2  ;;  %v377_v3 = vld [vmem:[%s3275_s21 + $0x2f0] sm:$0xff] }
  0x5c   : > { %3028 = vmatprep.subr.msk.bf16.mxu1 %vm713_vm0, %v467_v6  ;;  %v446_v6 = vpack.c.bf16 %v354_v0, %v353_v63  ;;  %622 = vperm.xlu1 %3078, %v519_v4   ;;  %v1904_v63 = vld [vmem:[%s4277_s4 + $0x20] sm:$0xff]  ;;  %v378_v4 = vld [vmem:[%s3275_s21 + $0x2f8] sm:$0xff] }
  0x5d   : > { %647 = vperm.xlu0 %3077, %v524_v5   ;;  %v907_v16 = vsel %vm713_vm0, %v462_v8, 0  ;;  %v3633_v5 = vld [vmem:[%s4274_s1 + $0x38] sm:$0xff]   ;;  %v458_v10 = vpack.c.bf16 %v378_v4, %v377_v3 }
  0x5e   : > { %v859_v14 = vsel %vm713_vm0, %v446_v6, 0  ;;  %v409_v6 = vld [vmem:[%s3275_s21 + $0x3f0] sm:$0xff]  ;;  %v410_v8 = vld [vmem:[%s3275_s21 + $0x3f8] sm:$0xff] }
  0x5f   : > { %v474_v12 = vpack.c.bf16 %v410_v8, %v409_v6 }
  0x60   : > { %632 = vperm.xlu1 %3078, %v521_v13   ;;  %v361_v13 = vld [vmem:[%s3275_s21 + $0x270] sm:$0xff] }
  0x61   : > { %2853 = vmatmul.mubr.msk.bf16.vlgmr.msra.gmra.mrb[0].mxu0 %vm713_vm0, %v3265_v1 }
  0x62   : > { %2895 = vmatmul.mubr.msk.bf16.vlgmr.msra.gmra.mrb[0].mxu1 %vm713_vm0, %v3265_v1  ;;  %2921 = vmatpush3.bf16.xpose.msra.mxu0 %v850_v21  ;;  %v388_v21 = vld [vmem:[%s3275_s21 + $0x348] sm:$0xff] }
  0x63   : > { %2963 = vmatpush3.bf16.xpose.msra.mxu1 %v898_v23  ;;  %2854 = vmatprep.mubr.msk.bf16.mxu0 %vm713_vm0, %v3438_v22  ;;  %v1901_v23 = vld [vmem:[%s4277_s4 + $0x8] sm:$0xff] }
  0x64   : > { %2896 = vmatprep.mubr.msk.bf16.mxu1 %vm713_vm0, %v3438_v22  ;;  %3021 = vmatprep.subr.msk.bf16.mxu0 %vm713_vm0, %v452_v24  ;;  %v523_v24 = vld [vmem:[%s4275_s2 + $0xb8] sm:$0xff] }
  0x65   : > { %3029 = vmatprep.subr.msk.bf16.mxu1 %vm713_vm0, %v468_v27  ;;  %v463_v27 = vpack.c.bf16 %v388_v21, %v387_v20  ;;  %1914 = vperm.xlu0 %3077, %v1901_v23   ;;  %v3659_v20 = vld [vmem:[%s4274_s1 + $0x40] sm:$0xff]  }
  0x66   : > { %642 = vperm.xlu1 %3078, %v523_v24   ;;  %v3088_v24 = vld [vmem:[%s4274_s1 + $0x48] sm:$0xff]  }
  0x67   : > { %v910_v36 = vsel %vm713_vm0, %v463_v27, 0  ;;  %v3090_v27 = vld [vmem:[%s4274_s1 + $0x58] sm:$0xff]  }
  0x69   : > { %2855 = vmatmul.mubr.msk.bf16.gmra.mrb[4].mxu0 %vm713_vm0, %v3438_v22  ;;  %1924 = vperm.xlu0 %3077, %v1903_v33  }
  0x6a   : > { %2897 = vmatmul.mubr.msk.bf16.gmra.mrb[4].mxu1 %vm713_vm0, %v3438_v22  ;;  %2923 = vmatpush3.bf16.xpose.msra.mxu0 %v853_v40  ;;  %v389_v40 = vld [vmem:[%s3275_s21 + $0x350] sm:$0xff] }
  0x6b   : > { %2965 = vmatpush3.bf16.xpose.msra.mxu1 %v901_v42  ;;  %2856 = vmatprep.mubr.msk.bf16.mxu0 %vm713_vm0, %v3472_v41  ;;  %v390_v42 = vld [vmem:[%s3275_s21 + $0x358] sm:$0xff] }
  0x6c   : > { %2898 = vmatprep.mubr.msk.bf16.mxu1 %vm713_vm0, %v3472_v41  ;;  %3022 = vmatprep.subr.msk.bf16.mxu0 %vm713_vm0, %v453_v43  ;;  %v1900_v43 = vld [vmem:[%s4277_s4] sm:$0xff]  ;;  %v464_v47 = vpack.c.bf16 %v390_v42, %v389_v40 }
  0x6d   : > { %3030 = vmatprep.subr.msk.bf16.mxu1 %vm713_vm0, %v469_v44  ;;  %v1905_v44 = vld [vmem:[%s4277_s4 + $0x28] sm:$0xff]  ;;  %1909 = vperm.xlu1 %3078, %v1900_v43  }
  0x6e   : > { %1934 = vperm.xlu0 %3077, %v1905_v44   ;;  %v913_v56 = vsel %vm713_vm0, %v464_v47, 0 }
  0x71   : > { %2857 = vmatmul.mubr.msk.bf16.gmra.mrb[8].mxu0 %vm713_vm0, %v3472_v41  ;;  %1919 = vperm.xlu1 %3078, %v1902_v53  }
  0x72   : > { %2899 = vmatmul.mubr.msk.bf16.gmra.mrb[8].mxu1 %vm713_vm0, %v3472_v41  ;;  %2858 = vmatprep.mubr.msk.bf16.mxu0 %vm713_vm0, %v3497_v52 }
  0x73   : > { %2900 = vmatprep.mubr.msk.bf16.mxu1 %vm713_vm0, %v3497_v52  ;;  %2925 = vmatpush3.bf16.xpose.msra.mxu0 %v856_v59  ;;  %v360_v59 = vld [vmem:[%s3275_s21 + $0x268] sm:$0xff] }
  0x74   : > { %2967 = vmatpush3.bf16.xpose.msra.mxu1 %v904_v61  ;;  %3023 = vmatprep.subr.msk.bf16.mxu0 %vm713_vm0, %v454_v60  ;;  %v391_v60 = vld [vmem:[%s3275_s21 + $0x360] sm:$0xff]  ;;  %v392_v61 = vld [vmem:[%s3275_s21 + $0x368] sm:$0xff]  ;;  %v449_v0 = vpack.c.bf16 %v360_v59, %v359_v58 }
  0x75   : > { %3031 = vmatprep.subr.msk.bf16.mxu1 %vm713_vm0, %v470_v62  ;;  %v2386_v62 = vld [vmem:[#allocation2] sm:$0x1]  ;;  %v465_v2 = vpack.c.bf16 %v392_v61, %v391_v60  ;;  %1929 = vperm.xlu1 %3078, %v1904_v63  }
  0x76   : > { %2389 = vperm.xlu0 %3077, %v2386_v62   ;;  %v868_v9 = vsel %vm713_vm0, %v449_v0, 0 }
  0x77   : > { %v916_v11 = vsel %vm713_vm0, %v465_v2, 0 }
  0x79   : > { %2859 = vmatmul.mubr.msk.bf16.gmra.mrb[12].mxu0 %vm713_vm0, %v3497_v52 }
  0x7a   : > { %2901 = vmatmul.mubr.msk.bf16.gmra.mrb[12].mxu1 %vm713_vm0, %v3497_v52  ;;  %2860 = vmatprep.mubr.msk.bf16.mxu0 %vm713_vm0, %v3531_v7 }
  0x7b   : > { %2902 = vmatprep.mubr.msk.bf16.mxu1 %vm713_vm0, %v3531_v7  ;;  %2927 = vmatpush3.bf16.xpose.msra.mxu0 %v859_v14  ;;  %v362_v14 = vld [vmem:[%s3275_s21 + $0x278] sm:$0xff] }
  0x7c   : > { %2969 = vmatpush3.bf16.xpose.msra.mxu1 %v907_v16  ;;  %3024 = vmatprep.subr.msk.bf16.mxu0 %vm713_vm0, %v455_v15  ;;  %v393_v15 = vld [vmem:[%s3275_s21 + $0x370] sm:$0xff]  ;;  %v394_v16 = vld [vmem:[%s3275_s21 + $0x378] sm:$0xff]  ;;  %v450_v18 = vpack.c.bf16 %v362_v14, %v361_v13 }
  0x7d   : > { %3032 = vmatprep.subr.msk.bf16.mxu1 %vm713_vm0, %v471_v17  ;;  %v1906_v17 = vld [vmem:[%s4277_s4 + $0x30] sm:$0x3]  ;;  %v466_v19 = vpack.c.bf16 %v394_v16, %v393_v15 }
  0x7e   : > { %1939 = vperm.xlu1 %3078, %v1906_v17   ;;  %v871_v21 = vsel %vm713_vm0, %v450_v18, 0 }
  0x7f   : > { %v919_v23 = vsel %vm713_vm0, %v466_v19, 0 }
  0x81   : > { %2861 = vmatmul.mubr.msk.bf16.gmra.mrb[16].mxu0 %vm713_vm0, %v3531_v7 }
  0x82   : > { %2903 = vmatmul.mubr.msk.bf16.gmra.mrb[16].mxu1 %vm713_vm0, %v3531_v7  ;;  %2862 = vmatprep.mubr.msk.bf16.mxu0 %vm713_vm0, %v3565_v26 }
  0x83   : > { %2904 = vmatprep.mubr.msk.bf16.mxu1 %vm713_vm0, %v3565_v26  ;;  %2929 = vmatpush3.bf16.xpose.msra.mxu0 %v862_v34 }
  0x84   : > { %2971 = vmatpush3.bf16.xpose.msra.mxu1 %v910_v36  ;;  %3025 = vmatprep.subr.msk.bf16.mxu0 %vm713_vm0, %v456_v35 }
  0x85   : > { %3033 = vmatprep.subr.msk.bf16.mxu1 %vm713_vm0, %v472_v37 }
  0x89   : > { %2863 = vmatmul.mubr.msk.bf16.gmra.mrb[20].mxu0 %vm713_vm0, %v3565_v26 }
  0x8a   : > { %2905 = vmatmul.mubr.msk.bf16.gmra.mrb[20].mxu1 %vm713_vm0, %v3565_v26  ;;  %2864 = vmatprep.mubr.msk.bf16.mxu0 %vm713_vm0, %v3599_v46 }
  0x8b   : > { %2906 = vmatprep.mubr.msk.bf16.mxu1 %vm713_vm0, %v3599_v46  ;;  %2931 = vmatpush3.bf16.xpose.msra.mxu0 %v865_v54 }
  0x8c   : > { %2973 = vmatpush3.bf16.xpose.msra.mxu1 %v913_v56  ;;  %3026 = vmatprep.subr.msk.bf16.mxu0 %vm713_vm0, %v457_v55 }
  0x8d   : > { %3034 = vmatprep.subr.msk.bf16.mxu1 %vm713_vm0, %v473_v57 }
  0x91   : > { %2865 = vmatmul.mubr.msk.bf16.gmra.mrb[24].mxu0 %vm713_vm0, %v3599_v46 }
  0x92   : > { %2907 = vmatmul.mubr.msk.bf16.gmra.mrb[24].mxu1 %vm713_vm0, %v3599_v46  ;;  %2866 = vmatprep.mubr.msk.bf16.mxu0 %vm713_vm0, %v3633_v5 }
  0x93   : > { %2908 = vmatprep.mubr.msk.bf16.mxu1 %vm713_vm0, %v3633_v5  ;;  %2933 = vmatpush3.bf16.xpose.msra.mxu0 %v868_v9 }
  0x94   : > { %2975 = vmatpush3.bf16.xpose.msra.mxu1 %v916_v11  ;;  %3027 = vmatprep.subr.msk.bf16.mxu0 %vm713_vm0, %v458_v10 }
  0x95   : > { %3035 = vmatprep.subr.msk.bf16.mxu1 %vm713_vm0, %v474_v12 }
  0x99   : > { %2867 = vmatmul.mubr.msk.bf16.gmra.mrb[28].mxu0 %vm713_vm0, %v3633_v5 }
  0x9a   : > { %2909 = vmatmul.mubr.msk.bf16.gmra.mrb[28].mxu1 %vm713_vm0, %v3633_v5  ;;  %2868 = vmatprep.mubr.msk.bf16.mxu0 %vm713_vm0, %v3659_v20 }
  0x9b   : > { %2910 = vmatprep.mubr.msk.bf16.mxu1 %vm713_vm0, %v3659_v20  ;;  %2935 = vmatpush3.bf16.xpose.msra.mxu0 %v871_v21 }
  0x9c   : > { %2977 = vmatpush3.bf16.xpose.msra.mxu1 %v919_v23 }
  0xa1   : > { %2869 = vmatmul.mubr.msk.bf16.gmra.mrb[32].mxu0 %vm713_vm0, %v3659_v20 }
  0xa2   : > { %2911 = vmatmul.mubr.msk.bf16.gmra.mrb[32].mxu1 %vm713_vm0, %v3659_v20  ;;  %2870 = vmatprep.mubr.msk.bf16.mxu0 %vm713_vm0, %v3088_v24 }
  0xa3   : > { %2912 = vmatprep.mubr.msk.bf16.mxu1 %vm713_vm0, %v3088_v24 }
  0xa9   : > { %2871 = vmatmul.mubr.msk.bf16.gmra.mrb[36].mxu0 %vm713_vm0, %v3088_v24 }
  0xaa   : > { %2913 = vmatmul.mubr.msk.bf16.gmra.mrb[36].mxu1 %vm713_vm0, %v3088_v24  ;;  %2872 = vmatprep.mubr.msk.bf16.mxu0 %vm713_vm0, %v3089_v25 }
  0xab   : > { %2914 = vmatprep.mubr.msk.bf16.mxu1 %vm713_vm0, %v3089_v25 }
  0xb1   : > { %2873 = vmatmul.mubr.msk.bf16.gmra.mrb[40].mxu0 %vm713_vm0, %v3089_v25 }
  0xb2   : > { %2915 = vmatmul.mubr.msk.bf16.gmra.mrb[40].mxu1 %vm713_vm0, %v3089_v25  ;;  %2874 = vmatprep.mubr.msk.bf16.mxu0 %vm713_vm0, %v3090_v27 }
  0xb3   : > { %2916 = vmatprep.mubr.msk.bf16.mxu1 %vm713_vm0, %v3090_v27 }
  0xb9   : > { %2875 = vmatmul.mubr.msk.bf16.gmra.mrb[44].mxu0 %vm713_vm0, %v3090_v27 }
  0xba   : > { %2917 = vmatmul.mubr.msk.bf16.gmra.mrb[44].mxu1 %vm713_vm0, %v3090_v27  ;;  %2876 = vmatprep.mubr.msk.bf16.mxu0 %vm713_vm0, %v3091_v28 }
  0xbb   : > { %2918 = vmatprep.mubr.msk.bf16.mxu1 %vm713_vm0, %v3091_v28 }
  0xc1   : > { %2877 = vmatmul.mubr.msk.bf16.gmra.mrb[48].mxu0 %vm713_vm0, %v3091_v28 }
  0xc2   : > { %2919 = vmatmul.mubr.msk.bf16.gmra.mrb[48].mxu1 %vm713_vm0, %v3091_v28  ;;  %2936 = vmatprep.mubr.msk.bf16.mxu0 %vm713_vm0, %v3265_v1 }
  0xc3   : > { %2978 = vmatprep.mubr.msk.bf16.mxu1 %vm713_vm0, %v3265_v1 }
  0xc9   : > { %2937 = vmatmul.mubr.msk.bf16.vlgmr.msra.gmra.mrb[52].mxu0 %vm713_vm0, %v3265_v1 }
  0xca   : > { %2979 = vmatmul.mubr.msk.bf16.vlgmr.msra.gmra.mrb[52].mxu1 %vm713_vm0, %v3265_v1  ;;  %2938 = vmatprep.mubr.msk.bf16.mxu0 %vm713_vm0, %v3438_v22  ;;  %v3094_v1 = vld [vmem:[%s4276_s3 + $0x4] ss:$8 sps:$4 sm:$0xff]  }
  0xcb   : > { %2980 = vmatprep.mubr.msk.bf16.mxu1 %vm713_vm0, %v3438_v22 }
  0xd1   : > { %2939 = vmatmul.mubr.msk.bf16.gmra.mrb[56].mxu0 %vm713_vm0, %v3438_v22 }
  0xd2   : > { %2981 = vmatmul.mubr.msk.bf16.gmra.mrb[56].mxu1 %vm713_vm0, %v3438_v22  ;;  %2940 = vmatprep.mubr.msk.bf16.mxu0 %vm713_vm0, %v3472_v41  ;;  %v3796_v22 = vpop.permute.xlu0 %527 }
  0xd3   : > { %2982 = vmatprep.mubr.msk.bf16.mxu1 %vm713_vm0, %v3472_v41 }
  0xd9   : > { %2941 = vmatmul.mubr.msk.bf16.gmra.mrb[60].mxu0 %vm713_vm0, %v3472_v41 }
  0xda   : > { %2983 = vmatmul.mubr.msk.bf16.gmra.mrb[60].mxu1 %vm713_vm0, %v3472_v41  ;;  %2942 = vmatprep.mubr.msk.bf16.mxu0 %vm713_vm0, %v3497_v52  ;;  %v3798_v41 = vpop.permute.xlu1 %537 }
  0xdb   : > { %2984 = vmatprep.mubr.msk.bf16.mxu1 %vm713_vm0, %v3497_v52 }
  0xde   : > { %v3810_v55 = vpop.permute.xlu1 %542 }
  0xe1   : > { %2943 = vmatmul.mubr.msk.bf16.gmra.mrb[64].mxu0 %vm713_vm0, %v3497_v52 }
  0xe2   : > { %2985 = vmatmul.mubr.msk.bf16.gmra.mrb[64].mxu1 %vm713_vm0, %v3497_v52  ;;  %2944 = vmatprep.mubr.msk.bf16.mxu0 %vm713_vm0, %v3531_v7  ;;  %v3800_v52 = vpop.permute.xlu0 %532 }
  0xe3   : > { %2986 = vmatprep.mubr.msk.bf16.mxu1 %vm713_vm0, %v3531_v7 }
  0xe6   : > { %v3820_v15 = vpop.permute.xlu0 %547 }
  0xe9   : > { %2945 = vmatmul.mubr.msk.bf16.gmra.mrb[68].mxu0 %vm713_vm0, %v3531_v7 }
  0xea   : > { %2987 = vmatmul.mubr.msk.bf16.gmra.mrb[68].mxu1 %vm713_vm0, %v3531_v7  ;;  %2946 = vmatprep.mubr.msk.bf16.mxu0 %vm713_vm0, %v3565_v26 }
  0xeb   : > { %2988 = vmatprep.mubr.msk.bf16.mxu1 %vm713_vm0, %v3565_v26 }
  0xf1   : > { %2947 = vmatmul.mubr.msk.bf16.gmra.mrb[72].mxu0 %vm713_vm0, %v3565_v26 }
  0xf2   : > { %2989 = vmatmul.mubr.msk.bf16.gmra.mrb[72].mxu1 %vm713_vm0, %v3565_v26  ;;  %2948 = vmatprep.mubr.msk.bf16.mxu0 %vm713_vm0, %v3599_v46 }
  0xf3   : > { %2990 = vmatprep.mubr.msk.bf16.mxu1 %vm713_vm0, %v3599_v46 }
  0xf9   : > { %2949 = vmatmul.mubr.msk.bf16.gmra.mrb[76].mxu0 %vm713_vm0, %v3599_v46 }
  0xfa   : > { %2991 = vmatmul.mubr.msk.bf16.gmra.mrb[76].mxu1 %vm713_vm0, %v3599_v46  ;;  %2950 = vmatprep.mubr.msk.bf16.mxu0 %vm713_vm0, %v3633_v5 }
  0xfb   : > { %2992 = vmatprep.mubr.msk.bf16.mxu1 %vm713_vm0, %v3633_v5 }
 0x101   : > { %2951 = vmatmul.mubr.msk.bf16.gmra.mrb[80].mxu0 %vm713_vm0, %v3633_v5 }
 0x102   : > { %2993 = vmatmul.mubr.msk.bf16.gmra.mrb[80].mxu1 %vm713_vm0, %v3633_v5  ;;  %2952 = vmatprep.mubr.msk.bf16.mxu0 %vm713_vm0, %v3659_v20 }
 0x103   : > { %2994 = vmatprep.mubr.msk.bf16.mxu1 %vm713_vm0, %v3659_v20 }
 0x109   : > { %2953 = vmatmul.mubr.msk.bf16.gmra.mrb[84].mxu0 %vm713_vm0, %v3659_v20 }
 0x10a   : > { %2995 = vmatmul.mubr.msk.bf16.gmra.mrb[84].mxu1 %vm713_vm0, %v3659_v20  ;;  %2954 = vmatprep.mubr.msk.bf16.mxu0 %vm713_vm0, %v3088_v24 }
 0x10b   : > { %2996 = vmatprep.mubr.msk.bf16.mxu1 %vm713_vm0, %v3088_v24 }
 0x111   : > { %2955 = vmatmul.mubr.msk.bf16.gmra.mrb[88].mxu0 %vm713_vm0, %v3088_v24 }
 0x112   : > { %2997 = vmatmul.mubr.msk.bf16.gmra.mrb[88].mxu1 %vm713_vm0, %v3088_v24  ;;  %2956 = vmatprep.mubr.msk.bf16.mxu0 %vm713_vm0, %v3089_v25  ;;  %v3822_v24 = vpop.permute.xlu1 %552 }
 0x113   : > { %2998 = vmatprep.mubr.msk.bf16.mxu1 %vm713_vm0, %v3089_v25 }
 0x119   : > { %2957 = vmatmul.mubr.msk.bf16.gmra.mrb[92].mxu0 %vm713_vm0, %v3089_v25 }
 0x11a   : > { %2999 = vmatmul.mubr.msk.bf16.gmra.mrb[92].mxu1 %vm713_vm0, %v3089_v25  ;;  %2958 = vmatprep.mubr.msk.bf16.mxu0 %vm713_vm0, %v3090_v27 }
 0x11b   : > { %3000 = vmatprep.mubr.msk.bf16.mxu1 %vm713_vm0, %v3090_v27 }
 0x121   : > { %2959 = vmatmul.mubr.msk.bf16.gmra.mrb[96].mxu0 %vm713_vm0, %v3090_v27 }
 0x122   : > { %3001 = vmatmul.mubr.msk.bf16.gmra.mrb[96].mxu1 %vm713_vm0, %v3090_v27  ;;  %2960 = vmatprep.mubr.msk.bf16.mxu0 %vm713_vm0, %v3091_v28 }
 0x123   : > { %3002 = vmatprep.mubr.msk.bf16.mxu1 %vm713_vm0, %v3091_v28 }
 0x129   : > { %2961 = vmatmul.mubr.msk.bf16.gmra.mrb[100].mxu0 %vm713_vm0, %v3091_v28 }
 0x12a   : > { %3003 = vmatmul.mubr.msk.bf16.gmra.mrb[100].mxu1 %vm713_vm0, %v3091_v28  ;;  %2803 = vmatprep.mubr.msk.bf16.mxu0 %vm1975_vm1, %v3094_v1 }
 0x12b   : > { %2808 = vmatprep.mubr.msk.bf16.mxu1 %vm1975_vm1, %v3094_v1 }
 0x134   : > { %v979_v7 = vpop.f32.mrb[0].mxu0 }
 0x135   : > { %v980_v26 = vadd.f32 %v979_v7, %v3796_v22  ;;  %v1140_v29 = vpop.f32.mrb[0].mxu1  ;;  %v981_v31 = vpop.f32.mrb[1].mxu0 }
 0x136   : > { %v1141_v32 = vadd.f32 %v1140_v29, %v3796_v22  ;;  %v982_v33 = vadd.f32 %v981_v31, %v3796_v22  ;;  %v1142_v34 = vpop.f32.mrb[1].mxu1  ;;  %v983_v35 = vpop.f32.mrb[2].mxu0 }
 0x137   : > { %v1143_v36 = vadd.f32 %v1142_v34, %v3796_v22  ;;  %v984_v37 = vadd.f32 %v983_v35, %v3800_v52  ;;  %v1144_v38 = vpop.f32.mrb[2].mxu1  ;;  %v985_v39 = vpop.f32.mrb[3].mxu0  ;;  %v1589_v44 = vmax.f32 %v980_v26, 0.0 }
 0x138   : > { %v1145_v40 = vadd.f32 %v1144_v38, %v3800_v52  ;;  %v986_v42 = vadd.f32 %v985_v39, %v3800_v52  ;;  %v1146_v43 = vpop.f32.mrb[3].mxu1  ;;  %v1591_v47 = vmax.f32 %v1141_v32, 0.0  ;;  %v1590_v48 = vmax.f32 %v982_v33, 0.0 }
 0x139   : > { %v1597_v45 = vmax.f32 %v984_v37, 0.0  ;;  %v1147_v46 = vadd.f32 %v1146_v43, %v3800_v52  ;;  %v1592_v51 = vmax.f32 %v1143_v36, 0.0 }
 0x13a   : > { %v1599_v49 = vmax.f32 %v1145_v40, 0.0  ;;  %v1598_v50 = vmax.f32 %v986_v42, 0.0 }
 0x13b   : > { %v1789_v53 = vpack.c.bf16 %v1597_v45, %v1589_v44  ;;  %v1600_v54 = vmax.f32 %v1147_v46, 0.0  ;;  %v3832_v46 = vpop.permute.xlu0 %557 }
 0x13c   : > { %v1791_v56 = vpack.c.bf16 %v1599_v49, %v1591_v47  ;;  %v1790_v57 = vpack.c.bf16 %v1598_v50, %v1590_v48  ;;  %v989_v58 = vpop.f32.mrb[4].mxu0 }
 0x13d   : > { %v1792_v59 = vpack.c.bf16 %v1600_v54, %v1592_v51  ;;  %v990_v60 = vadd.f32 %v989_v58, %v3798_v41  ;;  %v1150_v61 = vpop.f32.mrb[4].mxu1  ;;  %v991_v62 = vpop.f32.mrb[5].mxu0 }
 0x13e   : > { %v1151_v63 = vadd.f32 %v1150_v61, %v3798_v41  ;;  %v992_v0 = vadd.f32 %v991_v62, %v3798_v41  ;;  %v1152_v2 = vpop.f32.mrb[5].mxu1  ;;  %v993_v3 = vpop.f32.mrb[6].mxu0  ;;  %2013 = vmatprep.subr.bf16.mxu0 %v1790_v57 }
 0x13f   : > { %v1153_v4 = vadd.f32 %v1152_v2, %v3798_v41  ;;  %v994_v5 = vadd.f32 %v993_v3, %v3810_v55  ;;  %v1154_v6 = vpop.f32.mrb[6].mxu1  ;;  %2084 = vmatprep.subr.bf16.mxu1 %v1792_v59  ;;  %v995_v8 = vpop.f32.mrb[7].mxu0  ;;  %2014 = vmatpush1.bf16.msra.mxu0 %v1789_v53  ;;  %v1605_v12 = vmax.f32 %v990_v60, 0.0 }
 0x140   : > { %v1155_v9 = vadd.f32 %v1154_v6, %v3810_v55  ;;  %v996_v10 = vadd.f32 %v995_v8, %v3810_v55  ;;  %v1156_v11 = vpop.f32.mrb[7].mxu1  ;;  %2085 = vmatpush1.bf16.msra.mxu1 %v1791_v56  ;;  %v1607_v16 = vmax.f32 %v1151_v63, 0.0  ;;  %v1606_v17 = vmax.f32 %v992_v0, 0.0  ;;  %v3834_v56 = vpop.permute.xlu1 %562 }
 0x141   : > { %v1613_v13 = vmax.f32 %v994_v5, 0.0  ;;  %v1157_v14 = vadd.f32 %v1156_v11, %v3810_v55  ;;  %v1608_v20 = vmax.f32 %v1153_v4, 0.0 }
 0x142   : > { %v1615_v18 = vmax.f32 %v1155_v9, 0.0  ;;  %v1614_v19 = vmax.f32 %v996_v10, 0.0 }
 0x143   : > { %v1797_v21 = vpack.c.bf16 %v1613_v13, %v1605_v12  ;;  %v1616_v23 = vmax.f32 %v1157_v14, 0.0 }
 0x144   : > { %v1799_v25 = vpack.c.bf16 %v1615_v18, %v1607_v16  ;;  %v1798_v27 = vpack.c.bf16 %v1614_v19, %v1606_v17  ;;  %v999_v28 = vpop.f32.mrb[8].mxu0  ;;  %v3844_v17 = vpop.permute.xlu0 %567 }
 0x145   : > { %v1800_v1 = vpack.c.bf16 %v1616_v23, %v1608_v20  ;;  %v1000_v7 = vadd.f32 %v999_v28, %v3820_v15  ;;  %v1160_v26 = vpop.f32.mrb[8].mxu1  ;;  %v1001_v29 = vpop.f32.mrb[9].mxu0 }
 0x146   : > { %v1161_v31 = vadd.f32 %v1160_v26, %v3820_v15  ;;  %v1002_v32 = vadd.f32 %v1001_v29, %v3820_v15  ;;  %v1162_v33 = vpop.f32.mrb[9].mxu1  ;;  %v1003_v34 = vpop.f32.mrb[10].mxu0  ;;  %2015 = vmatprep.subr.bf16.mxu0 %v1798_v27 }
 0x147   : > { %v1163_v35 = vadd.f32 %v1162_v33, %v3820_v15  ;;  %v1004_v36 = vadd.f32 %v1003_v34, %v3822_v24  ;;  %v1164_v37 = vpop.f32.mrb[10].mxu1  ;;  %2086 = vmatprep.subr.bf16.mxu1 %v1800_v1  ;;  %v1005_v38 = vpop.f32.mrb[11].mxu0  ;;  %2016 = vmatpush1.bf16.msra.mxu0 %v1797_v21  ;;  %v1621_v43 = vmax.f32 %v1000_v7, 0.0 }
 0x148   : > { %v1165_v39 = vadd.f32 %v1164_v37, %v3822_v24  ;;  %v1006_v40 = vadd.f32 %v1005_v38, %v3822_v24  ;;  %v1166_v42 = vpop.f32.mrb[11].mxu1  ;;  %2087 = vmatpush1.bf16.msra.mxu1 %v1799_v25  ;;  %v1623_v47 = vmax.f32 %v1161_v31, 0.0  ;;  %v1622_v48 = vmax.f32 %v1002_v32, 0.0  ;;  %v3846_v28 = vpop.permute.xlu1 %572 }
 0x149   : > { %v1629_v44 = vmax.f32 %v1004_v36, 0.0  ;;  %v1167_v45 = vadd.f32 %v1166_v42, %v3822_v24  ;;  %v1624_v51 = vmax.f32 %v1163_v35, 0.0 }
 0x14a   : > { %v1631_v49 = vmax.f32 %v1165_v39, 0.0  ;;  %v1630_v50 = vmax.f32 %v1006_v40, 0.0 }
 0x14b   : > { %v1805_v53 = vpack.c.bf16 %v1629_v44, %v1621_v43  ;;  %v1632_v54 = vmax.f32 %v1167_v45, 0.0 }
 0x14c   : > { %v1807_v57 = vpack.c.bf16 %v1631_v49, %v1623_v47  ;;  %v1806_v58 = vpack.c.bf16 %v1630_v50, %v1622_v48  ;;  %v1009_v59 = vpop.f32.mrb[12].mxu0  ;;  %v3856_v50 = vpop.permute.xlu0 %577 }
 0x14d   : > { %v1808_v60 = vpack.c.bf16 %v1632_v54, %v1624_v51  ;;  %v1010_v61 = vadd.f32 %v1009_v59, %v3832_v46  ;;  %v1170_v62 = vpop.f32.mrb[12].mxu1  ;;  %v1011_v63 = vpop.f32.mrb[13].mxu0 }
 0x14e   : > { %v1171_v0 = vadd.f32 %v1170_v62, %v3832_v46  ;;  %v1012_v2 = vadd.f32 %v1011_v63, %v3832_v46  ;;  %v1172_v3 = vpop.f32.mrb[13].mxu1  ;;  %v1013_v4 = vpop.f32.mrb[14].mxu0  ;;  %2017 = vmatprep.subr.bf16.mxu0 %v1806_v58 }
 0x14f   : > { %v1173_v5 = vadd.f32 %v1172_v3, %v3832_v46  ;;  %v1014_v6 = vadd.f32 %v1013_v4, %v3834_v56  ;;  %v1174_v8 = vpop.f32.mrb[14].mxu1  ;;  %2088 = vmatprep.subr.bf16.mxu1 %v1808_v60  ;;  %v1015_v9 = vpop.f32.mrb[15].mxu0  ;;  %2018 = vmatpush1.bf16.msra.mxu0 %v1805_v53  ;;  %v1637_v13 = vmax.f32 %v1010_v61, 0.0 }
 0x150   : > { %v1175_v10 = vadd.f32 %v1174_v8, %v3834_v56  ;;  %v1016_v11 = vadd.f32 %v1015_v9, %v3834_v56  ;;  %v1176_v12 = vpop.f32.mrb[15].mxu1  ;;  %2089 = vmatpush1.bf16.msra.mxu1 %v1807_v57  ;;  %v1639_v18 = vmax.f32 %v1171_v0, 0.0  ;;  %v1638_v19 = vmax.f32 %v1012_v2, 0.0  ;;  %v3858_v61 = vpop.permute.xlu1 %582 }
 0x151   : > { %v1645_v14 = vmax.f32 %v1014_v6, 0.0  ;;  %v1177_v16 = vadd.f32 %v1176_v12, %v3834_v56  ;;  %v1640_v23 = vmax.f32 %v1173_v5, 0.0 }
 0x152   : > { %v1647_v20 = vmax.f32 %v1175_v10, 0.0  ;;  %v1646_v21 = vmax.f32 %v1016_v11, 0.0 }
 0x153   : > { %v1813_v25 = vpack.c.bf16 %v1645_v14, %v1637_v13  ;;  %v1648_v27 = vmax.f32 %v1177_v16, 0.0 }
 0x154   : > { %v1815_v1 = vpack.c.bf16 %v1647_v20, %v1639_v18  ;;  %v1814_v7 = vpack.c.bf16 %v1646_v21, %v1638_v19  ;;  %v1019_v26 = vpop.f32.mrb[16].mxu0 }
 0x155   : > { %v1816_v29 = vpack.c.bf16 %v1648_v27, %v1640_v23  ;;  %v1020_v31 = vadd.f32 %v1019_v26, %v3844_v17  ;;  %v1180_v32 = vpop.f32.mrb[16].mxu1  ;;  %v1021_v33 = vpop.f32.mrb[17].mxu0 }
 0x156   : > { %v1181_v34 = vadd.f32 %v1180_v32, %v3844_v17  ;;  %v1022_v35 = vadd.f32 %v1021_v33, %v3844_v17  ;;  %v1182_v36 = vpop.f32.mrb[17].mxu1  ;;  %v1023_v37 = vpop.f32.mrb[18].mxu0  ;;  %2019 = vmatprep.subr.bf16.mxu0 %v1814_v7 }
 0x157   : > { %v1183_v38 = vadd.f32 %v1182_v36, %v3844_v17  ;;  %v1024_v39 = vadd.f32 %v1023_v37, %v3846_v28  ;;  %v1184_v40 = vpop.f32.mrb[18].mxu1  ;;  %2090 = vmatprep.subr.bf16.mxu1 %v1816_v29  ;;  %v1025_v42 = vpop.f32.mrb[19].mxu0  ;;  %2020 = vmatpush1.bf16.msra.mxu0 %v1813_v25  ;;  %v1653_v47 = vmax.f32 %v1020_v31, 0.0 }
 0x158   : > { %v1185_v43 = vadd.f32 %v1184_v40, %v3846_v28  ;;  %v1026_v44 = vadd.f32 %v1025_v42, %v3846_v28  ;;  %v1186_v45 = vpop.f32.mrb[19].mxu1  ;;  %2091 = vmatpush1.bf16.msra.mxu1 %v1815_v1  ;;  %v1655_v51 = vmax.f32 %v1181_v34, 0.0  ;;  %v1654_v53 = vmax.f32 %v1022_v35, 0.0  ;;  %v3868_v25 = vpop.permute.xlu0 %587 }
 0x159   : > { %v1661_v48 = vmax.f32 %v1024_v39, 0.0  ;;  %v1187_v49 = vadd.f32 %v1186_v45, %v3846_v28  ;;  %v1656_v58 = vmax.f32 %v1183_v38, 0.0  ;;  %v3870_v33 = vpop.permute.xlu1 %592 }
 0x15a   : > { %v1663_v54 = vmax.f32 %v1185_v43, 0.0  ;;  %v1662_v57 = vmax.f32 %v1026_v44, 0.0 }
 0x15b   : > { %v1821_v59 = vpack.c.bf16 %v1661_v48, %v1653_v47  ;;  %v1664_v60 = vmax.f32 %v1187_v49, 0.0 }
 0x15c   : > { %v1823_v62 = vpack.c.bf16 %v1663_v54, %v1655_v51  ;;  %v1822_v63 = vpack.c.bf16 %v1662_v57, %v1654_v53  ;;  %v1029_v0 = vpop.f32.mrb[20].mxu0 }
 0x15d   : > { %v1824_v2 = vpack.c.bf16 %v1664_v60, %v1656_v58  ;;  %v1030_v3 = vadd.f32 %v1029_v0, %v3856_v50  ;;  %v1190_v4 = vpop.f32.mrb[20].mxu1  ;;  %v1031_v5 = vpop.f32.mrb[21].mxu0 }
 0x15e   : > { %v1191_v6 = vadd.f32 %v1190_v4, %v3856_v50  ;;  %v1032_v8 = vadd.f32 %v1031_v5, %v3856_v50  ;;  %v1192_v9 = vpop.f32.mrb[21].mxu1  ;;  %v1033_v10 = vpop.f32.mrb[22].mxu0  ;;  %2021 = vmatprep.subr.bf16.mxu0 %v1822_v63 }
 0x15f   : > { %v1193_v11 = vadd.f32 %v1192_v9, %v3856_v50  ;;  %v1034_v12 = vadd.f32 %v1033_v10, %v3858_v61  ;;  %v1194_v13 = vpop.f32.mrb[22].mxu1  ;;  %2092 = vmatprep.subr.bf16.mxu1 %v1824_v2  ;;  %v1035_v14 = vpop.f32.mrb[23].mxu0  ;;  %2022 = vmatpush1.bf16.msra.mxu0 %v1821_v59  ;;  %v1669_v20 = vmax.f32 %v1030_v3, 0.0 }
 0x160   : > { %v1195_v16 = vadd.f32 %v1194_v13, %v3858_v61  ;;  %v1036_v18 = vadd.f32 %v1035_v14, %v3858_v61  ;;  %v1196_v19 = vpop.f32.mrb[23].mxu1  ;;  %2093 = vmatpush1.bf16.msra.mxu1 %v1823_v62  ;;  %v1671_v27 = vmax.f32 %v1191_v6, 0.0  ;;  %v1670_v1 = vmax.f32 %v1032_v8, 0.0  ;;  %v3880_v62 = vpop.permute.xlu0 %597 }
 0x161   : > { %v1677_v21 = vmax.f32 %v1034_v12, 0.0  ;;  %v1197_v23 = vadd.f32 %v1196_v19, %v3858_v61  ;;  %v1672_v29 = vmax.f32 %v1193_v11, 0.0  ;;  %v3882_v8 = vpop.permute.xlu1 %602 }
 0x162   : > { %v1679_v7 = vmax.f32 %v1195_v16, 0.0  ;;  %v1678_v26 = vmax.f32 %v1036_v18, 0.0 }
 0x163   : > { %v1829_v31 = vpack.c.bf16 %v1677_v21, %v1669_v20  ;;  %v1680_v32 = vmax.f32 %v1197_v23, 0.0 }
 0x164   : > { %v1831_v34 = vpack.c.bf16 %v1679_v7, %v1671_v27  ;;  %v1830_v35 = vpack.c.bf16 %v1678_v26, %v1670_v1  ;;  %v1039_v36 = vpop.f32.mrb[24].mxu0 }
 0x165   : > { %v1832_v37 = vpack.c.bf16 %v1680_v32, %v1672_v29  ;;  %v1040_v38 = vadd.f32 %v1039_v36, %v3868_v25  ;;  %v1200_v39 = vpop.f32.mrb[24].mxu1  ;;  %v1041_v40 = vpop.f32.mrb[25].mxu0 }
 0x166   : > { %v1201_v42 = vadd.f32 %v1200_v39, %v3868_v25  ;;  %v1042_v43 = vadd.f32 %v1041_v40, %v3868_v25  ;;  %v1202_v44 = vpop.f32.mrb[25].mxu1  ;;  %v1043_v45 = vpop.f32.mrb[26].mxu0  ;;  %2023 = vmatprep.subr.bf16.mxu0 %v1830_v35 }
 0x167   : > { %v1203_v47 = vadd.f32 %v1202_v44, %v3868_v25  ;;  %v1044_v48 = vadd.f32 %v1043_v45, %v3870_v33  ;;  %v1204_v49 = vpop.f32.mrb[26].mxu1  ;;  %2094 = vmatprep.subr.bf16.mxu1 %v1832_v37  ;;  %v1045_v51 = vpop.f32.mrb[27].mxu0  ;;  %2024 = vmatpush1.bf16.msra.mxu0 %v1829_v31  ;;  %v1685_v58 = vmax.f32 %v1040_v38, 0.0 }
 0x168   : > { %v1205_v53 = vadd.f32 %v1204_v49, %v3870_v33  ;;  %v1046_v54 = vadd.f32 %v1045_v51, %v3870_v33  ;;  %v1206_v57 = vpop.f32.mrb[27].mxu1  ;;  %2095 = vmatpush1.bf16.msra.mxu1 %v1831_v34  ;;  %v1687_v63 = vmax.f32 %v1201_v42, 0.0  ;;  %v1686_v0 = vmax.f32 %v1042_v43, 0.0  ;;  %v3892_v36 = vpop.permute.xlu0 %607 }
 0x169   : > { %v1693_v59 = vmax.f32 %v1044_v48, 0.0  ;;  %v1207_v60 = vadd.f32 %v1206_v57, %v3870_v33  ;;  %v1688_v4 = vmax.f32 %v1203_v47, 0.0  ;;  %v3894_v45 = vpop.permute.xlu1 %612 }
 0x16a   : > { %v1695_v2 = vmax.f32 %v1205_v53, 0.0  ;;  %v1694_v3 = vmax.f32 %v1046_v54, 0.0 }
 0x16b   : > { %v1837_v5 = vpack.c.bf16 %v1693_v59, %v1685_v58  ;;  %v1696_v6 = vmax.f32 %v1207_v60, 0.0 }
 0x16c   : > { %v1839_v9 = vpack.c.bf16 %v1695_v2, %v1687_v63  ;;  %v1838_v10 = vpack.c.bf16 %v1694_v3, %v1686_v0  ;;  %v1049_v11 = vpop.f32.mrb[28].mxu0 }
 0x16d   : > { %v1840_v12 = vpack.c.bf16 %v1696_v6, %v1688_v4  ;;  %v1050_v13 = vadd.f32 %v1049_v11, %v3880_v62  ;;  %v1210_v14 = vpop.f32.mrb[28].mxu1  ;;  %v1051_v16 = vpop.f32.mrb[29].mxu0 }
 0x16e   : > { %v1211_v18 = vadd.f32 %v1210_v14, %v3880_v62  ;;  %v1052_v19 = vadd.f32 %v1051_v16, %v3880_v62  ;;  %v1212_v20 = vpop.f32.mrb[29].mxu1  ;;  %v1053_v21 = vpop.f32.mrb[30].mxu0  ;;  %2025 = vmatprep.subr.bf16.mxu0 %v1838_v10 }
 0x16f   : > { %v1213_v23 = vadd.f32 %v1212_v20, %v3880_v62  ;;  %v1054_v27 = vadd.f32 %v1053_v21, %v3882_v8  ;;  %v1214_v1 = vpop.f32.mrb[30].mxu1  ;;  %2096 = vmatprep.subr.bf16.mxu1 %v1840_v12  ;;  %v1055_v7 = vpop.f32.mrb[31].mxu0  ;;  %2026 = vmatpush1.bf16.msra.mxu0 %v1837_v5  ;;  %v1701_v32 = vmax.f32 %v1050_v13, 0.0 }
 0x170   : > { %v1215_v26 = vadd.f32 %v1214_v1, %v3882_v8  ;;  %v1056_v29 = vadd.f32 %v1055_v7, %v3882_v8  ;;  %v1216_v31 = vpop.f32.mrb[31].mxu1  ;;  %2097 = vmatpush1.bf16.msra.mxu1 %v1839_v9  ;;  %v1703_v37 = vmax.f32 %v1211_v18, 0.0  ;;  %v1702_v38 = vmax.f32 %v1052_v19, 0.0  ;;  %v3904_v19 = vpop.permute.xlu0 %617 }
 0x171   : > { %v1709_v34 = vmax.f32 %v1054_v27, 0.0  ;;  %v1217_v35 = vadd.f32 %v1216_v31, %v3882_v8  ;;  %v1704_v42 = vmax.f32 %v1213_v23, 0.0  ;;  %v3906_v27 = vpop.permute.xlu1 %622 }
 0x172   : > { %v1711_v39 = vmax.f32 %v1215_v26, 0.0  ;;  %v1710_v40 = vmax.f32 %v1056_v29, 0.0 }
 0x173   : > { %v1845_v43 = vpack.c.bf16 %v1709_v34, %v1701_v32  ;;  %v1712_v44 = vmax.f32 %v1217_v35, 0.0 }
 0x174   : > { %v1847_v47 = vpack.c.bf16 %v1711_v39, %v1703_v37  ;;  %v1846_v48 = vpack.c.bf16 %v1710_v40, %v1702_v38  ;;  %v1059_v49 = vpop.f32.mrb[32].mxu0 }
 0x175   : > { %v1848_v51 = vpack.c.bf16 %v1712_v44, %v1704_v42  ;;  %v1060_v53 = vadd.f32 %v1059_v49, %v3892_v36  ;;  %v1220_v54 = vpop.f32.mrb[32].mxu1  ;;  %v1061_v57 = vpop.f32.mrb[33].mxu0 }
 0x176   : > { %v1221_v58 = vadd.f32 %v1220_v54, %v3892_v36  ;;  %v1062_v59 = vadd.f32 %v1061_v57, %v3892_v36  ;;  %v1222_v60 = vpop.f32.mrb[33].mxu1  ;;  %v1063_v63 = vpop.f32.mrb[34].mxu0  ;;  %2027 = vmatprep.subr.bf16.mxu0 %v1846_v48 }
 0x177   : > { %v1223_v0 = vadd.f32 %v1222_v60, %v3892_v36  ;;  %v1064_v2 = vadd.f32 %v1063_v63, %v3894_v45  ;;  %v1224_v3 = vpop.f32.mrb[34].mxu1  ;;  %2098 = vmatprep.subr.bf16.mxu1 %v1848_v51  ;;  %v1065_v4 = vpop.f32.mrb[35].mxu0  ;;  %2028 = vmatpush1.bf16.msra.mxu0 %v1845_v43  ;;  %v1717_v10 = vmax.f32 %v1060_v53, 0.0 }
 0x178   : > { %v1225_v5 = vadd.f32 %v1224_v3, %v3894_v45  ;;  %v1066_v6 = vadd.f32 %v1065_v4, %v3894_v45  ;;  %v1226_v9 = vpop.f32.mrb[35].mxu1  ;;  %2099 = vmatpush1.bf16.msra.mxu1 %v1847_v47  ;;  %v1719_v13 = vmax.f32 %v1221_v58, 0.0  ;;  %v1718_v14 = vmax.f32 %v1062_v59, 0.0  ;;  %v3916_v63 = vpop.permute.xlu0 %627 }
 0x179   : > { %v1725_v11 = vmax.f32 %v1064_v2, 0.0  ;;  %v1227_v12 = vadd.f32 %v1226_v9, %v3894_v45  ;;  %v1720_v20 = vmax.f32 %v1223_v0, 0.0  ;;  %v3918_v4 = vpop.permute.xlu1 %632 }
 0x17a   : > { %v1727_v16 = vmax.f32 %v1225_v5, 0.0  ;;  %v1726_v18 = vmax.f32 %v1066_v6, 0.0 }
 0x17b   : > { %v1853_v21 = vpack.c.bf16 %v1725_v11, %v1717_v10  ;;  %v1728_v23 = vmax.f32 %v1227_v12, 0.0 }
 0x17c   : > { %v1855_v1 = vpack.c.bf16 %v1727_v16, %v1719_v13  ;;  %v1854_v7 = vpack.c.bf16 %v1726_v18, %v1718_v14  ;;  %v1069_v26 = vpop.f32.mrb[36].mxu0 }
 0x17d   : > { %v1856_v29 = vpack.c.bf16 %v1728_v23, %v1720_v20  ;;  %v1070_v31 = vadd.f32 %v1069_v26, %v3904_v19  ;;  %v1230_v32 = vpop.f32.mrb[36].mxu1  ;;  %v1071_v34 = vpop.f32.mrb[37].mxu0 }
 0x17e   : > { %v1231_v35 = vadd.f32 %v1230_v32, %v3904_v19  ;;  %v1072_v37 = vadd.f32 %v1071_v34, %v3904_v19  ;;  %v1232_v38 = vpop.f32.mrb[37].mxu1  ;;  %v1073_v39 = vpop.f32.mrb[38].mxu0  ;;  %2029 = vmatprep.subr.bf16.mxu0 %v1854_v7 }
 0x17f   : > { %v1233_v40 = vadd.f32 %v1232_v38, %v3904_v19  ;;  %v1074_v42 = vadd.f32 %v1073_v39, %v3906_v27  ;;  %v1234_v43 = vpop.f32.mrb[38].mxu1  ;;  %2100 = vmatprep.subr.bf16.mxu1 %v1856_v29  ;;  %v1075_v44 = vpop.f32.mrb[39].mxu0  ;;  %2030 = vmatpush1.bf16.msra.mxu0 %v1853_v21  ;;  %v1733_v51 = vmax.f32 %v1070_v31, 0.0 }
 0x180   : > { %v1235_v47 = vadd.f32 %v1234_v43, %v3906_v27  ;;  %v1076_v48 = vadd.f32 %v1075_v44, %v3906_v27  ;;  %v1236_v49 = vpop.f32.mrb[39].mxu1  ;;  %2101 = vmatpush1.bf16.msra.mxu1 %v1855_v1  ;;  %v1735_v57 = vmax.f32 %v1231_v35, 0.0  ;;  %v1734_v58 = vmax.f32 %v1072_v37, 0.0 }
 0x181   : > { %v1741_v53 = vmax.f32 %v1074_v42, 0.0  ;;  %v1237_v54 = vadd.f32 %v1236_v49, %v3906_v27  ;;  %v1736_v0 = vmax.f32 %v1233_v40, 0.0  ;;  %v3928_v42 = vpop.permute.xlu0 %637 }
 0x182   : > { %v1743_v59 = vmax.f32 %v1235_v47, 0.0  ;;  %v1742_v60 = vmax.f32 %v1076_v48, 0.0  ;;  %v3930_v48 = vpop.permute.xlu1 %642 }
 0x183   : > { %v1861_v2 = vpack.c.bf16 %v1741_v53, %v1733_v51  ;;  %v1744_v3 = vmax.f32 %v1237_v54, 0.0 }
 0x184   : > { %v1863_v5 = vpack.c.bf16 %v1743_v59, %v1735_v57  ;;  %v1862_v6 = vpack.c.bf16 %v1742_v60, %v1734_v58  ;;  %v1079_v9 = vpop.f32.mrb[40].mxu0 }
 0x185   : > { %v1864_v10 = vpack.c.bf16 %v1744_v3, %v1736_v0  ;;  %v1080_v11 = vadd.f32 %v1079_v9, %v3916_v63  ;;  %v1240_v12 = vpop.f32.mrb[40].mxu1  ;;  %v1081_v13 = vpop.f32.mrb[41].mxu0 }
 0x186   : > { %v1241_v14 = vadd.f32 %v1240_v12, %v3916_v63  ;;  %v1082_v16 = vadd.f32 %v1081_v13, %v3916_v63  ;;  %v1242_v18 = vpop.f32.mrb[41].mxu1  ;;  %v1083_v20 = vpop.f32.mrb[42].mxu0  ;;  %2031 = vmatprep.subr.bf16.mxu0 %v1862_v6 }
 0x187   : > { %v1243_v21 = vadd.f32 %v1242_v18, %v3916_v63  ;;  %v1084_v23 = vadd.f32 %v1083_v20, %v3918_v4  ;;  %v1244_v1 = vpop.f32.mrb[42].mxu1  ;;  %2102 = vmatprep.subr.bf16.mxu1 %v1864_v10  ;;  %v1085_v7 = vpop.f32.mrb[43].mxu0  ;;  %2032 = vmatpush1.bf16.msra.mxu0 %v1861_v2  ;;  %v1749_v32 = vmax.f32 %v1080_v11, 0.0 }
 0x188   : > { %v1245_v26 = vadd.f32 %v1244_v1, %v3918_v4  ;;  %v1086_v29 = vadd.f32 %v1085_v7, %v3918_v4  ;;  %v1246_v31 = vpop.f32.mrb[43].mxu1  ;;  %2103 = vmatpush1.bf16.msra.mxu1 %v1863_v5  ;;  %v1751_v37 = vmax.f32 %v1241_v14, 0.0  ;;  %v1750_v38 = vmax.f32 %v1082_v16, 0.0 }
 0x189   : > { %v1757_v34 = vmax.f32 %v1084_v23, 0.0  ;;  %v1247_v35 = vadd.f32 %v1246_v31, %v3918_v4  ;;  %v1752_v43 = vmax.f32 %v1243_v21, 0.0  ;;  %v3940_v31 = vpop.permute.xlu0 %647 }
 0x18a   : > { %v1759_v39 = vmax.f32 %v1245_v26, 0.0  ;;  %v1758_v40 = vmax.f32 %v1086_v29, 0.0 }
 0x18b   : > { %v1869_v44 = vpack.c.bf16 %v1757_v34, %v1749_v32  ;;  %v1760_v47 = vmax.f32 %v1247_v35, 0.0 }
 0x18c   : > { %v1871_v49 = vpack.c.bf16 %v1759_v39, %v1751_v37  ;;  %v1870_v51 = vpack.c.bf16 %v1758_v40, %v1750_v38  ;;  %v1089_v53 = vpop.f32.mrb[44].mxu0 }
 0x18d   : > { %v1872_v54 = vpack.c.bf16 %v1760_v47, %v1752_v43  ;;  %v1090_v57 = vadd.f32 %v1089_v53, %v3928_v42  ;;  %v1250_v58 = vpop.f32.mrb[44].mxu1  ;;  %v1091_v59 = vpop.f32.mrb[45].mxu0 }
 0x18e   : > { %v1251_v60 = vadd.f32 %v1250_v58, %v3928_v42  ;;  %v1092_v0 = vadd.f32 %v1091_v59, %v3928_v42  ;;  %v1252_v2 = vpop.f32.mrb[45].mxu1  ;;  %v1093_v3 = vpop.f32.mrb[46].mxu0  ;;  %2033 = vmatprep.subr.bf16.mxu0 %v1870_v51 }
 0x18f   : > { %v1253_v5 = vadd.f32 %v1252_v2, %v3928_v42  ;;  %v1094_v6 = vadd.f32 %v1093_v3, %v3930_v48  ;;  %v1254_v9 = vpop.f32.mrb[46].mxu1  ;;  %2104 = vmatprep.subr.bf16.mxu1 %v1872_v54  ;;  %v1095_v10 = vpop.f32.mrb[47].mxu0  ;;  %2034 = vmatpush1.bf16.msra.mxu0 %v1869_v44  ;;  %v1765_v14 = vmax.f32 %v1090_v57, 0.0 }
 0x190   : > { %v1255_v11 = vadd.f32 %v1254_v9, %v3930_v48  ;;  %v1096_v12 = vadd.f32 %v1095_v10, %v3930_v48  ;;  %v1256_v13 = vpop.f32.mrb[47].mxu1  ;;  %2105 = vmatpush1.bf16.msra.mxu1 %v1871_v49  ;;  %v1767_v20 = vmax.f32 %v1251_v60, 0.0  ;;  %v1766_v21 = vmax.f32 %v1092_v0, 0.0 }
 0x191   : > { %v1773_v16 = vmax.f32 %v1094_v6, 0.0  ;;  %v1257_v18 = vadd.f32 %v1256_v13, %v3930_v48  ;;  %v1768_v7 = vmax.f32 %v1253_v5, 0.0 }
 0x192   : > { %v1775_v23 = vmax.f32 %v1255_v11, 0.0  ;;  %v1774_v1 = vmax.f32 %v1096_v12, 0.0  ;;  %v3952_v12 = vld [vmem:[%s4276_s3] ss:$8 sps:$4 sm:$0xff]  }
 0x193   : > { %v1877_v26 = vpack.c.bf16 %v1773_v16, %v1765_v14  ;;  %v1776_v29 = vmax.f32 %v1257_v18, 0.0  ;;  %v3959_v18 = vld [vmem:[%s4276_s3 + $0x14] ss:$8 sps:$4 sm:$0xff]  }
 0x194   : > { %v1879_v32 = vpack.c.bf16 %v1775_v23, %v1767_v20  ;;  %v1878_v34 = vpack.c.bf16 %v1774_v1, %v1766_v21  ;;  %v1099_v35 = vpop.f32.mrb[48].mxu0 }
 0x195   : > { %v1880_v37 = vpack.c.bf16 %v1776_v29, %v1768_v7  ;;  %v1100_v38 = vadd.f32 %v1099_v35, %v3940_v31  ;;  %v1260_v39 = vpop.f32.mrb[48].mxu1  ;;  %v1101_v40 = vpop.f32.mrb[49].mxu0 }
 0x196   : > { %v1261_v43 = vadd.f32 %v1260_v39, %v3940_v31  ;;  %v1102_v44 = vadd.f32 %v1101_v40, %v3940_v31  ;;  %v1262_v47 = vpop.f32.mrb[49].mxu1  ;;  %v1103_v49 = vpop.f32.mrb[50].mxu0  ;;  %2035 = vmatprep.subr.bf16.mxu0 %v1878_v34 }
 0x197   : > { %v1781_v51 = vmax.f32 %v1100_v38, 0.0  ;;  %v1263_v53 = vadd.f32 %v1262_v47, %v3940_v31  ;;  %v1264_v54 = vpop.f32.mrb[50].mxu1  ;;  %2106 = vmatprep.subr.bf16.mxu1 %v1880_v37  ;;  %v1104_v57 = vpop.f32.mrb[51].mxu0  ;;  %2036 = vmatpush1.bf16.msra.mxu0 %v1877_v26 }
 0x198   : > { %v1783_v58 = vmax.f32 %v1261_v43, 0.0  ;;  %v1782_v59 = vmax.f32 %v1102_v44, 0.0  ;;  %v1265_v60 = vpop.f32.mrb[51].mxu1  ;;  %2107 = vmatpush1.bf16.msra.mxu1 %v1879_v32 }
 0x199   : > { %v1885_v0 = vpack.c.bf16 %v1781_v51, %v1781_v51  ;;  %v1784_v2 = vmax.f32 %v1263_v53, 0.0 }
 0x19a   : > { %v1887_v3 = vpack.c.bf16 %v1783_v58, %v1783_v58  ;;  %v1886_v5 = vpack.c.bf16 %v1782_v59, %v1782_v59 }
 0x19b   : > { %v1888_v6 = vpack.c.bf16 %v1784_v2, %v1784_v2  ;;  %v1990_v9 = vsel %vm1988_vm2, %v1885_v0, 0 }
 0x19c   : > { %v1301_v10 = vpop.f32.mrb[52].mxu0  ;;  %2802 = vmatprep.subr.msk.bf16.mxu0 %vm1988_vm2, %v1886_v5  ;;  %v1996_v11 = vsel %vm1988_vm2, %v1887_v3, 0  ;;  %v3983_v3 = vld [vmem:[%s4276_s3 + $0x24] ss:$8 sps:$4 sm:$0xff]  }
 0x19d   : > { %v1302_v13 = vadd.f32 %v1301_v10, %v3796_v22  ;;  %v1462_v14 = vpop.f32.mrb[52].mxu1  ;;  %2807 = vmatprep.subr.msk.bf16.mxu1 %vm1988_vm2, %v1888_v6  ;;  %v1303_v16 = vpop.f32.mrb[53].mxu0  ;;  %2038 = vmatpush1.bf16.msra.mxu0 %v1990_v9 }
 0x19e   : > { %v1463_v20 = vadd.f32 %v1462_v14, %v3796_v22  ;;  %v1304_v21 = vadd.f32 %v1303_v16, %v3796_v22  ;;  %v1464_v23 = vpop.f32.mrb[53].mxu1  ;;  %2109 = vmatpush1.bf16.msra.mxu1 %v1996_v11  ;;  %v1305_v1 = vpop.f32.mrb[54].mxu0 }
 0x19f   : > { %v1465_v7 = vadd.f32 %v1464_v23, %v3796_v22  ;;  %v1306_v26 = vadd.f32 %v1305_v1, %v3800_v52  ;;  %v1466_v29 = vpop.f32.mrb[54].mxu1  ;;  %v1307_v32 = vpop.f32.mrb[55].mxu0  ;;  %v1593_v38 = vmax.f32 %v1302_v13, 0.0 }
 0x1a0   : > { %v1467_v34 = vadd.f32 %v1466_v29, %v3800_v52  ;;  %v1308_v35 = vadd.f32 %v1307_v32, %v3800_v52  ;;  %v1468_v37 = vpop.f32.mrb[55].mxu1  ;;  %2046 = vmatmul.mubr.bf16.vlgmr.msra.gmra.mrb[104].mxu0 %v3952_v12  ;;  %v1595_v22 = vmax.f32 %v1463_v20, 0.0  ;;  %v1594_v43 = vmax.f32 %v1304_v21, 0.0 }
 0x1a1   : > { %v1601_v39 = vmax.f32 %v1306_v26, 0.0  ;;  %v1469_v40 = vadd.f32 %v1468_v37, %v3800_v52  ;;  %2117 = vmatmul.mubr.bf16.vlgmr.msra.gmra.mrb[104].mxu1 %v3952_v12  ;;  %2804 = vmatprep.mubr.msk.bf16.mxu0 %vm1975_vm1, %v3959_v18  ;;  %v1596_v49 = vmax.f32 %v1465_v7, 0.0  ;;  %v3977_v52 = vld [vmem:[%s4276_s3 + $0x10] ss:$8 sps:$4 sm:$0xff]  }
 0x1a2   : > { %v1603_v44 = vmax.f32 %v1467_v34, 0.0  ;;  %v1602_v47 = vmax.f32 %v1308_v35, 0.0  ;;  %2809 = vmatprep.mubr.msk.bf16.mxu1 %vm1975_vm1, %v3959_v18  ;;  %v1899_v35 = vld [vmem:[%s4276_s3 + $0x30] sm:$0x11] }
 0x1a3   : > { %v1793_v51 = vpack.c.bf16 %v1601_v39, %v1593_v38  ;;  %v1604_v53 = vmax.f32 %v1469_v40, 0.0 }
 0x1a4   : > { %v1795_v54 = vpack.c.bf16 %v1603_v44, %v1595_v22  ;;  %v1794_v57 = vpack.c.bf16 %v1602_v47, %v1594_v43  ;;  %v1311_v58 = vpop.f32.mrb[56].mxu0  ;;  %v4004_v43 = vld [vmem:[%s4276_s3 + $0x20] ss:$8 sps:$4 sm:$0xff]  }
 0x1a5   : > { %v1796_v59 = vpack.c.bf16 %v1604_v53, %v1596_v49  ;;  %v1312_v60 = vadd.f32 %v1311_v58, %v3798_v41  ;;  %v1472_v0 = vpop.f32.mrb[56].mxu1  ;;  %v1313_v2 = vpop.f32.mrb[57].mxu0  ;;  %v4007_v53 = vcombine.high %v1899_v35, %v1899_v35 }
 0x1a6   : > { %v1473_v5 = vadd.f32 %v1472_v0, %v3798_v41  ;;  %v1314_v6 = vadd.f32 %v1313_v2, %v3798_v41  ;;  %v1474_v9 = vpop.f32.mrb[57].mxu1  ;;  %v1315_v10 = vpop.f32.mrb[58].mxu0  ;;  %2155 = vmatprep.subr.bf16.mxu0 %v1794_v57 }
 0x1a7   : > { %v1475_v11 = vadd.f32 %v1474_v9, %v3798_v41  ;;  %v1316_v13 = vadd.f32 %v1315_v10, %v3810_v55  ;;  %v1476_v14 = vpop.f32.mrb[58].mxu1  ;;  %2226 = vmatprep.subr.bf16.mxu1 %v1796_v59  ;;  %v1317_v16 = vpop.f32.mrb[59].mxu0  ;;  %2156 = vmatpush1.bf16.msra.mxu0 %v1793_v51  ;;  %v1609_v1 = vmax.f32 %v1312_v60, 0.0 }
 0x1a8   : > { %v1477_v20 = vadd.f32 %v1476_v14, %v3810_v55  ;;  %v1318_v21 = vadd.f32 %v1317_v16, %v3810_v55  ;;  %v1478_v23 = vpop.f32.mrb[59].mxu1  ;;  %2227 = vmatpush1.bf16.msra.mxu1 %v1795_v54  ;;  %2056 = vmatmul.mubr.bf16.gmra.mrb[108].mxu0 %v3977_v52  ;;  %v1611_v41 = vmax.f32 %v1473_v5, 0.0  ;;  %v1610_v29 = vmax.f32 %v1314_v6, 0.0 }
 0x1a9   : > { %v1617_v7 = vmax.f32 %v1316_v13, 0.0  ;;  %v1479_v26 = vadd.f32 %v1478_v23, %v3810_v55  ;;  %2127 = vmatmul.mubr.bf16.gmra.mrb[108].mxu1 %v3977_v52  ;;  %2805 = vmatprep.mubr.msk.bf16.mxu0 %vm1975_vm1, %v3983_v3  ;;  %v1612_v37 = vmax.f32 %v1475_v11, 0.0 }
 0x1aa   : > { %v1619_v32 = vmax.f32 %v1477_v20, 0.0  ;;  %v1618_v34 = vmax.f32 %v1318_v21, 0.0  ;;  %2810 = vmatprep.mubr.msk.bf16.mxu1 %vm1975_vm1, %v3983_v3 }
 0x1ab   : > { %v1801_v38 = vpack.c.bf16 %v1617_v7, %v1609_v1  ;;  %v1620_v39 = vmax.f32 %v1479_v26, 0.0 }
 0x1ac   : > { %v1803_v55 = vpack.c.bf16 %v1619_v32, %v1611_v41  ;;  %v1802_v40 = vpack.c.bf16 %v1618_v34, %v1610_v29  ;;  %v1321_v22 = vpop.f32.mrb[60].mxu0  ;;  %v4022_v32 = vcombine.low %v1899_v35, %v1899_v35 }
 0x1ad   : > { %v1804_v44 = vpack.c.bf16 %v1620_v39, %v1612_v37  ;;  %v1322_v47 = vadd.f32 %v1321_v22, %v3820_v15  ;;  %v1482_v49 = vpop.f32.mrb[60].mxu1  ;;  %v1323_v51 = vpop.f32.mrb[61].mxu0 }
 0x1ae   : > { %v1483_v54 = vadd.f32 %v1482_v49, %v3820_v15  ;;  %v1324_v57 = vadd.f32 %v1323_v51, %v3820_v15  ;;  %v1484_v58 = vpop.f32.mrb[61].mxu1  ;;  %v1325_v59 = vpop.f32.mrb[62].mxu0  ;;  %2157 = vmatprep.subr.bf16.mxu0 %v1802_v40 }
 0x1af   : > { %v1485_v60 = vadd.f32 %v1484_v58, %v3820_v15  ;;  %v1326_v0 = vadd.f32 %v1325_v59, %v3822_v24  ;;  %v1486_v2 = vpop.f32.mrb[62].mxu1  ;;  %2228 = vmatprep.subr.bf16.mxu1 %v1804_v44  ;;  %v1327_v5 = vpop.f32.mrb[63].mxu0  ;;  %2158 = vmatpush1.bf16.msra.mxu0 %v1801_v38  ;;  %v1625_v11 = vmax.f32 %v1322_v47, 0.0 }
 0x1b0   : > { %v1487_v6 = vadd.f32 %v1486_v2, %v3822_v24  ;;  %v1328_v9 = vadd.f32 %v1327_v5, %v3822_v24  ;;  %v1488_v10 = vpop.f32.mrb[63].mxu1  ;;  %2229 = vmatpush1.bf16.msra.mxu1 %v1803_v55  ;;  %2066 = vmatmul.mubr.bf16.gmra.mrb[112].mxu0 %v4004_v43  ;;  %v1627_v15 = vmax.f32 %v1483_v54, 0.0  ;;  %v1626_v16 = vmax.f32 %v1324_v57, 0.0 }
 0x1b1   : > { %v1633_v13 = vmax.f32 %v1326_v0, 0.0  ;;  %v1489_v14 = vadd.f32 %v1488_v10, %v3822_v24  ;;  %2137 = vmatmul.mubr.bf16.gmra.mrb[112].mxu1 %v4004_v43  ;;  %2806 = vmatprep.mubr.msk.bf16.mxu0 %vm1975_vm1, %v4007_v53  ;;  %v1628_v23 = vmax.f32 %v1485_v60, 0.0 }
 0x1b2   : > { %v1635_v20 = vmax.f32 %v1487_v6, 0.0  ;;  %v1634_v21 = vmax.f32 %v1328_v9, 0.0  ;;  %2811 = vmatprep.mubr.msk.bf16.mxu1 %vm1975_vm1, %v4007_v53 }
 0x1b3   : > { %v1809_v1 = vpack.c.bf16 %v1633_v13, %v1625_v11  ;;  %v1636_v7 = vmax.f32 %v1489_v14, 0.0 }
 0x1b4   : > { %v1811_v26 = vpack.c.bf16 %v1635_v20, %v1627_v15  ;;  %v1810_v41 = vpack.c.bf16 %v1634_v21, %v1626_v16  ;;  %v1331_v29 = vpop.f32.mrb[64].mxu0 }
 0x1b5   : > { %v1812_v24 = vpack.c.bf16 %v1636_v7, %v1628_v23  ;;  %v1332_v34 = vadd.f32 %v1331_v29, %v3832_v46  ;;  %v1492_v37 = vpop.f32.mrb[64].mxu1  ;;  %v1333_v38 = vpop.f32.mrb[65].mxu0 }
 0x1b6   : > { %v1493_v39 = vadd.f32 %v1492_v37, %v3832_v46  ;;  %v1334_v55 = vadd.f32 %v1333_v38, %v3832_v46  ;;  %v1494_v40 = vpop.f32.mrb[65].mxu1  ;;  %v1335_v22 = vpop.f32.mrb[66].mxu0  ;;  %2159 = vmatprep.subr.bf16.mxu0 %v1810_v41 }
 0x1b7   : > { %v1495_v44 = vadd.f32 %v1494_v40, %v3832_v46  ;;  %v1336_v47 = vadd.f32 %v1335_v22, %v3834_v56  ;;  %v1496_v49 = vpop.f32.mrb[66].mxu1  ;;  %2230 = vmatprep.subr.bf16.mxu1 %v1812_v24  ;;  %v1337_v35 = vpop.f32.mrb[67].mxu0  ;;  %2160 = vmatpush1.bf16.msra.mxu0 %v1809_v1  ;;  %v1641_v58 = vmax.f32 %v1332_v34, 0.0  ;;  %v3103_v46 = vld [vmem:[%s4276_s3 + $0x4] ss:$8 sps:$4 sm:$0xff]  }
 0x1b8   : > { %v1497_v51 = vadd.f32 %v1496_v49, %v3834_v56  ;;  %v1338_v54 = vadd.f32 %v1337_v35, %v3834_v56  ;;  %v1498_v57 = vpop.f32.mrb[67].mxu1  ;;  %2231 = vmatpush1.bf16.msra.mxu1 %v1811_v26  ;;  %2076 = vmatmul.mubr.bf16.gmra.mrb[116].mxu0 %v4022_v32  ;;  %v1643_v0 = vmax.f32 %v1493_v39, 0.0  ;;  %v1642_v2 = vmax.f32 %v1334_v55, 0.0 }
 0x1b9   : > { %v1649_v59 = vmax.f32 %v1336_v47, 0.0  ;;  %v1499_v60 = vadd.f32 %v1498_v57, %v3834_v56  ;;  %2147 = vmatmul.mubr.bf16.gmra.mrb[116].mxu1 %v4022_v32  ;;  %2813 = vmatprep.mubr.msk.bf16.mxu0 %vm1975_vm1, %v3103_v46  ;;  %v1644_v9 = vmax.f32 %v1495_v44, 0.0 }
 0x1ba   : > { %v1651_v5 = vmax.f32 %v1497_v51, 0.0  ;;  %v1650_v6 = vmax.f32 %v1338_v54, 0.0  ;;  %2818 = vmatprep.mubr.msk.bf16.mxu1 %vm1975_vm1, %v3103_v46 }
 0x1bb   : > { %v1817_v10 = vpack.c.bf16 %v1649_v59, %v1641_v58  ;;  %v1652_v11 = vmax.f32 %v1499_v60, 0.0 }
 0x1bc   : > { %v1819_v13 = vpack.c.bf16 %v1651_v5, %v1643_v0  ;;  %v1818_v14 = vpack.c.bf16 %v1650_v6, %v1642_v2  ;;  %v1341_v56 = vpop.f32.mrb[68].mxu0 }
 0x1bd   : > { %v1820_v15 = vpack.c.bf16 %v1652_v11, %v1644_v9  ;;  %v1342_v16 = vadd.f32 %v1341_v56, %v3844_v17  ;;  %v1502_v20 = vpop.f32.mrb[68].mxu1  ;;  %v1343_v21 = vpop.f32.mrb[69].mxu0 }
 0x1be   : > { %v1503_v23 = vadd.f32 %v1502_v20, %v3844_v17  ;;  %v1344_v1 = vadd.f32 %v1343_v21, %v3844_v17  ;;  %v1504_v7 = vpop.f32.mrb[69].mxu1  ;;  %v1345_v26 = vpop.f32.mrb[70].mxu0  ;;  %2161 = vmatprep.subr.bf16.mxu0 %v1818_v14 }
 0x1bf   : > { %v1505_v41 = vadd.f32 %v1504_v7, %v3844_v17  ;;  %v1346_v29 = vadd.f32 %v1345_v26, %v3846_v28  ;;  %v1506_v24 = vpop.f32.mrb[70].mxu1  ;;  %2232 = vmatprep.subr.bf16.mxu1 %v1820_v15  ;;  %v1347_v34 = vpop.f32.mrb[71].mxu0  ;;  %2162 = vmatpush1.bf16.msra.mxu0 %v1817_v10  ;;  %v1657_v55 = vmax.f32 %v1342_v16, 0.0 }
 0x1c0   : > { %v1507_v37 = vadd.f32 %v1506_v24, %v3846_v28  ;;  %v1348_v38 = vadd.f32 %v1347_v34, %v3846_v28  ;;  %v1508_v39 = vpop.f32.mrb[71].mxu1  ;;  %2233 = vmatpush1.bf16.msra.mxu1 %v1819_v13  ;;  %v1659_v44 = vmax.f32 %v1503_v23, 0.0  ;;  %v1658_v47 = vmax.f32 %v1344_v1, 0.0 }
 0x1c1   : > { %v1665_v40 = vmax.f32 %v1346_v29, 0.0  ;;  %v1509_v22 = vadd.f32 %v1508_v39, %v3846_v28  ;;  %v1660_v35 = vmax.f32 %v1505_v41, 0.0 }
 0x1c2   : > { %v1667_v49 = vmax.f32 %v1507_v37, 0.0  ;;  %v1666_v17 = vmax.f32 %v1348_v38, 0.0 }
 0x1c3   : > { %v1825_v51 = vpack.c.bf16 %v1665_v40, %v1657_v55  ;;  %v1668_v54 = vmax.f32 %v1509_v22, 0.0 }
 0x1c4   : > { %v1827_v57 = vpack.c.bf16 %v1667_v49, %v1659_v44  ;;  %v1826_v58 = vpack.c.bf16 %v1666_v17, %v1658_v47  ;;  %v1351_v59 = vpop.f32.mrb[72].mxu0 }
 0x1c5   : > { %v1828_v60 = vpack.c.bf16 %v1668_v54, %v1660_v35  ;;  %v1352_v46 = vadd.f32 %v1351_v59, %v3856_v50  ;;  %v1512_v0 = vpop.f32.mrb[72].mxu1  ;;  %v1353_v2 = vpop.f32.mrb[73].mxu0 }
 0x1c6   : > { %v1513_v5 = vadd.f32 %v1512_v0, %v3856_v50  ;;  %v1354_v6 = vadd.f32 %v1353_v2, %v3856_v50  ;;  %v1514_v28 = vpop.f32.mrb[73].mxu1  ;;  %v1355_v9 = vpop.f32.mrb[74].mxu0  ;;  %2163 = vmatprep.subr.bf16.mxu0 %v1826_v58 }
 0x1c7   : > { %v1515_v10 = vadd.f32 %v1514_v28, %v3856_v50  ;;  %v1356_v11 = vadd.f32 %v1355_v9, %v3858_v61  ;;  %v1516_v13 = vpop.f32.mrb[74].mxu1  ;;  %2234 = vmatprep.subr.bf16.mxu1 %v1828_v60  ;;  %v1357_v14 = vpop.f32.mrb[75].mxu0  ;;  %2164 = vmatpush1.bf16.msra.mxu0 %v1825_v51  ;;  %v1673_v20 = vmax.f32 %v1352_v46, 0.0 }
 0x1c8   : > { %v1517_v56 = vadd.f32 %v1516_v13, %v3858_v61  ;;  %v1358_v15 = vadd.f32 %v1357_v14, %v3858_v61  ;;  %v1518_v16 = vpop.f32.mrb[75].mxu1  ;;  %2235 = vmatpush1.bf16.msra.mxu1 %v1827_v57  ;;  %v1675_v1 = vmax.f32 %v1513_v5, 0.0  ;;  %v1674_v7 = vmax.f32 %v1354_v6, 0.0 }
 0x1c9   : > { %v1681_v21 = vmax.f32 %v1356_v11, 0.0  ;;  %v1519_v23 = vadd.f32 %v1518_v16, %v3858_v61  ;;  %v1676_v41 = vmax.f32 %v1515_v10, 0.0 }
 0x1ca   : > { %v1683_v26 = vmax.f32 %v1517_v56, 0.0  ;;  %v1682_v50 = vmax.f32 %v1358_v15, 0.0 }
 0x1cb   : > { %v1833_v29 = vpack.c.bf16 %v1681_v21, %v1673_v20  ;;  %v1684_v24 = vmax.f32 %v1519_v23, 0.0 }
 0x1cc   : > { %v1835_v34 = vpack.c.bf16 %v1683_v26, %v1675_v1  ;;  %v1834_v37 = vpack.c.bf16 %v1682_v50, %v1674_v7  ;;  %v1361_v38 = vpop.f32.mrb[76].mxu0 }
 0x1cd   : > { %v1836_v39 = vpack.c.bf16 %v1684_v24, %v1676_v41  ;;  %v1362_v55 = vadd.f32 %v1361_v38, %v3868_v25  ;;  %v1522_v40 = vpop.f32.mrb[76].mxu1  ;;  %v1363_v22 = vpop.f32.mrb[77].mxu0 }
 0x1ce   : > { %v1523_v44 = vadd.f32 %v1522_v40, %v3868_v25  ;;  %v1364_v47 = vadd.f32 %v1363_v22, %v3868_v25  ;;  %v1524_v61 = vpop.f32.mrb[77].mxu1  ;;  %v1365_v49 = vpop.f32.mrb[78].mxu0  ;;  %2165 = vmatprep.subr.bf16.mxu0 %v1834_v37 }
 0x1cf   : > { %v1525_v17 = vadd.f32 %v1524_v61, %v3868_v25  ;;  %v1366_v35 = vadd.f32 %v1365_v49, %v3870_v33  ;;  %v1526_v51 = vpop.f32.mrb[78].mxu1  ;;  %2236 = vmatprep.subr.bf16.mxu1 %v1836_v39  ;;  %v1367_v54 = vpop.f32.mrb[79].mxu0  ;;  %2166 = vmatpush1.bf16.msra.mxu0 %v1833_v29  ;;  %v1689_v60 = vmax.f32 %v1362_v55, 0.0 }
 0x1d0   : > { %v1527_v57 = vadd.f32 %v1526_v51, %v3870_v33  ;;  %v1368_v58 = vadd.f32 %v1367_v54, %v3870_v33  ;;  %v1528_v59 = vpop.f32.mrb[79].mxu1  ;;  %2237 = vmatpush1.bf16.msra.mxu1 %v1835_v34  ;;  %v1691_v2 = vmax.f32 %v1523_v44, 0.0  ;;  %v1690_v5 = vmax.f32 %v1364_v47, 0.0 }
 0x1d1   : > { %v1697_v46 = vmax.f32 %v1366_v35, 0.0  ;;  %v1529_v0 = vadd.f32 %v1528_v59, %v3870_v33  ;;  %v1692_v28 = vmax.f32 %v1525_v17, 0.0 }
 0x1d2   : > { %v1699_v6 = vmax.f32 %v1527_v57, 0.0  ;;  %v1698_v25 = vmax.f32 %v1368_v58, 0.0 }
 0x1d3   : > { %v1841_v9 = vpack.c.bf16 %v1697_v46, %v1689_v60  ;;  %v1700_v10 = vmax.f32 %v1529_v0, 0.0 }
 0x1d4   : > { %v1843_v11 = vpack.c.bf16 %v1699_v6, %v1691_v2  ;;  %v1842_v13 = vpack.c.bf16 %v1698_v25, %v1690_v5  ;;  %v1371_v14 = vpop.f32.mrb[80].mxu0 }
 0x1d5   : > { %v1844_v56 = vpack.c.bf16 %v1700_v10, %v1692_v28  ;;  %v1372_v15 = vadd.f32 %v1371_v14, %v3880_v62  ;;  %v1532_v16 = vpop.f32.mrb[80].mxu1  ;;  %v1373_v20 = vpop.f32.mrb[81].mxu0 }
 0x1d6   : > { %v1533_v21 = vadd.f32 %v1532_v16, %v3880_v62  ;;  %v1374_v23 = vadd.f32 %v1373_v20, %v3880_v62  ;;  %v1534_v33 = vpop.f32.mrb[81].mxu1  ;;  %v1375_v1 = vpop.f32.mrb[82].mxu0  ;;  %2167 = vmatprep.subr.bf16.mxu0 %v1842_v13 }
 0x1d7   : > { %v1535_v7 = vadd.f32 %v1534_v33, %v3880_v62  ;;  %v1376_v26 = vadd.f32 %v1375_v1, %v3882_v8  ;;  %v1536_v50 = vpop.f32.mrb[82].mxu1  ;;  %2238 = vmatprep.subr.bf16.mxu1 %v1844_v56  ;;  %v1377_v41 = vpop.f32.mrb[83].mxu0  ;;  %2168 = vmatpush1.bf16.msra.mxu0 %v1841_v9  ;;  %v1705_v37 = vmax.f32 %v1372_v15, 0.0 }
 0x1d8   : > { %v1537_v29 = vadd.f32 %v1536_v50, %v3882_v8  ;;  %v1378_v24 = vadd.f32 %v1377_v41, %v3882_v8  ;;  %v1538_v34 = vpop.f32.mrb[83].mxu1  ;;  %2239 = vmatpush1.bf16.msra.mxu1 %v1843_v11  ;;  %v1707_v55 = vmax.f32 %v1533_v21, 0.0  ;;  %v1706_v40 = vmax.f32 %v1374_v23, 0.0 }
 0x1d9   : > { %v1713_v38 = vmax.f32 %v1376_v26, 0.0  ;;  %v1539_v39 = vadd.f32 %v1538_v34, %v3882_v8  ;;  %v1708_v44 = vmax.f32 %v1535_v7, 0.0 }
 0x1da   : > { %v1715_v22 = vmax.f32 %v1537_v29, 0.0  ;;  %v1714_v62 = vmax.f32 %v1378_v24, 0.0 }
 0x1db   : > { %v1849_v47 = vpack.c.bf16 %v1713_v38, %v1705_v37  ;;  %v1716_v61 = vmax.f32 %v1539_v39, 0.0 }
 0x1dc   : > { %v1851_v49 = vpack.c.bf16 %v1715_v22, %v1707_v55  ;;  %v1850_v17 = vpack.c.bf16 %v1714_v62, %v1706_v40  ;;  %v1381_v35 = vpop.f32.mrb[84].mxu0 }
 0x1dd   : > { %v1852_v51 = vpack.c.bf16 %v1716_v61, %v1708_v44  ;;  %v1382_v54 = vadd.f32 %v1381_v35, %v3892_v36  ;;  %v1542_v57 = vpop.f32.mrb[84].mxu1  ;;  %v1383_v58 = vpop.f32.mrb[85].mxu0 }
 0x1de   : > { %v1543_v59 = vadd.f32 %v1542_v57, %v3892_v36  ;;  %v1384_v60 = vadd.f32 %v1383_v58, %v3892_v36  ;;  %v1544_v8 = vpop.f32.mrb[85].mxu1  ;;  %v1385_v46 = vpop.f32.mrb[86].mxu0  ;;  %2169 = vmatprep.subr.bf16.mxu0 %v1850_v17 }
 0x1df   : > { %v1545_v0 = vadd.f32 %v1544_v8, %v3892_v36  ;;  %v1386_v2 = vadd.f32 %v1385_v46, %v3894_v45  ;;  %v1546_v5 = vpop.f32.mrb[86].mxu1  ;;  %2240 = vmatprep.subr.bf16.mxu1 %v1852_v51  ;;  %v1387_v6 = vpop.f32.mrb[87].mxu0  ;;  %2170 = vmatpush1.bf16.msra.mxu0 %v1849_v47  ;;  %v1721_v10 = vmax.f32 %v1382_v54, 0.0 }
 0x1e0   : > { %v1547_v25 = vadd.f32 %v1546_v5, %v3894_v45  ;;  %v1388_v28 = vadd.f32 %v1387_v6, %v3894_v45  ;;  %v1548_v9 = vpop.f32.mrb[87].mxu1  ;;  %2241 = vmatpush1.bf16.msra.mxu1 %v1851_v49  ;;  %v1723_v14 = vmax.f32 %v1543_v59, 0.0  ;;  %v1722_v56 = vmax.f32 %v1384_v60, 0.0 }
 0x1e1   : > { %v1729_v11 = vmax.f32 %v1386_v2, 0.0  ;;  %v1549_v13 = vadd.f32 %v1548_v9, %v3894_v45  ;;  %v1724_v16 = vmax.f32 %v1545_v0, 0.0 }
 0x1e2   : > { %v1731_v15 = vmax.f32 %v1547_v25, 0.0  ;;  %v1730_v36 = vmax.f32 %v1388_v28, 0.0 }
 0x1e3   : > { %v1857_v20 = vpack.c.bf16 %v1729_v11, %v1721_v10  ;;  %v1732_v21 = vmax.f32 %v1549_v13, 0.0 }
 0x1e4   : > { %v1859_v23 = vpack.c.bf16 %v1731_v15, %v1723_v14  ;;  %v1858_v33 = vpack.c.bf16 %v1730_v36, %v1722_v56  ;;  %v1391_v1 = vpop.f32.mrb[88].mxu0 }
 0x1e5   : > { %v1860_v7 = vpack.c.bf16 %v1732_v21, %v1724_v16  ;;  %v1392_v26 = vadd.f32 %v1391_v1, %v3904_v19  ;;  %v1552_v50 = vpop.f32.mrb[88].mxu1  ;;  %v1393_v41 = vpop.f32.mrb[89].mxu0 }
 0x1e6   : > { %v1553_v29 = vadd.f32 %v1552_v50, %v3904_v19  ;;  %v1394_v24 = vadd.f32 %v1393_v41, %v3904_v19  ;;  %v1554_v45 = vpop.f32.mrb[89].mxu1  ;;  %v1395_v34 = vpop.f32.mrb[90].mxu0  ;;  %2171 = vmatprep.subr.bf16.mxu0 %v1858_v33 }
 0x1e7   : > { %v1555_v37 = vadd.f32 %v1554_v45, %v3904_v19  ;;  %v1396_v38 = vadd.f32 %v1395_v34, %v3906_v27  ;;  %v1556_v39 = vpop.f32.mrb[90].mxu1  ;;  %2242 = vmatprep.subr.bf16.mxu1 %v1860_v7  ;;  %v1397_v55 = vpop.f32.mrb[91].mxu0  ;;  %2172 = vmatpush1.bf16.msra.mxu0 %v1857_v20  ;;  %v1737_v44 = vmax.f32 %v1392_v26, 0.0 }
 0x1e8   : > { %v1557_v40 = vadd.f32 %v1556_v39, %v3906_v27  ;;  %v1398_v22 = vadd.f32 %v1397_v55, %v3906_v27  ;;  %v1558_v62 = vpop.f32.mrb[91].mxu1  ;;  %2243 = vmatpush1.bf16.msra.mxu1 %v1859_v23  ;;  %v1739_v49 = vmax.f32 %v1553_v29, 0.0  ;;  %v1738_v17 = vmax.f32 %v1394_v24, 0.0 }
 0x1e9   : > { %v1745_v47 = vmax.f32 %v1396_v38, 0.0  ;;  %v1559_v61 = vadd.f32 %v1558_v62, %v3906_v27  ;;  %v1740_v51 = vmax.f32 %v1555_v37, 0.0 }
 0x1ea   : > { %v1747_v35 = vmax.f32 %v1557_v40, 0.0  ;;  %v1746_v19 = vmax.f32 %v1398_v22, 0.0 }
 0x1eb   : > { %v1865_v54 = vpack.c.bf16 %v1745_v47, %v1737_v44  ;;  %v1748_v57 = vmax.f32 %v1559_v61, 0.0 }
 0x1ec   : > { %v1867_v58 = vpack.c.bf16 %v1747_v35, %v1739_v49  ;;  %v1866_v59 = vpack.c.bf16 %v1746_v19, %v1738_v17  ;;  %v1401_v60 = vpop.f32.mrb[92].mxu0 }
 0x1ed   : > { %v1868_v8 = vpack.c.bf16 %v1748_v57, %v1740_v51  ;;  %v1402_v46 = vadd.f32 %v1401_v60, %v3916_v63  ;;  %v1562_v0 = vpop.f32.mrb[92].mxu1  ;;  %v1403_v2 = vpop.f32.mrb[93].mxu0 }
 0x1ee   : > { %v1563_v5 = vadd.f32 %v1562_v0, %v3916_v63  ;;  %v1404_v6 = vadd.f32 %v1403_v2, %v3916_v63  ;;  %v1564_v27 = vpop.f32.mrb[93].mxu1  ;;  %v1405_v25 = vpop.f32.mrb[94].mxu0  ;;  %2173 = vmatprep.subr.bf16.mxu0 %v1866_v59 }
 0x1ef   : > { %v1565_v28 = vadd.f32 %v1564_v27, %v3916_v63  ;;  %v1406_v9 = vadd.f32 %v1405_v25, %v3918_v4  ;;  %v1566_v10 = vpop.f32.mrb[94].mxu1  ;;  %2244 = vmatprep.subr.bf16.mxu1 %v1868_v8  ;;  %v1407_v11 = vpop.f32.mrb[95].mxu0  ;;  %2174 = vmatpush1.bf16.msra.mxu0 %v1865_v54  ;;  %v1753_v15 = vmax.f32 %v1402_v46, 0.0 }
 0x1f0   : > { %v1567_v13 = vadd.f32 %v1566_v10, %v3918_v4  ;;  %v1408_v14 = vadd.f32 %v1407_v11, %v3918_v4  ;;  %v1568_v56 = vpop.f32.mrb[95].mxu1  ;;  %2245 = vmatpush1.bf16.msra.mxu1 %v1867_v58  ;;  %v1755_v20 = vmax.f32 %v1563_v5, 0.0  ;;  %v1754_v21 = vmax.f32 %v1404_v6, 0.0 }
 0x1f1   : > { %v1761_v36 = vmax.f32 %v1406_v9, 0.0  ;;  %v1569_v16 = vadd.f32 %v1568_v56, %v3918_v4  ;;  %v1756_v33 = vmax.f32 %v1565_v28, 0.0 }
 0x1f2   : > { %v1763_v23 = vmax.f32 %v1567_v13, 0.0  ;;  %v1762_v63 = vmax.f32 %v1408_v14, 0.0 }
 0x1f3   : > { %v1873_v1 = vpack.c.bf16 %v1761_v36, %v1753_v15  ;;  %v1764_v7 = vmax.f32 %v1569_v16, 0.0 }
 0x1f4   : > { %v1875_v26 = vpack.c.bf16 %v1763_v23, %v1755_v20  ;;  %v1874_v50 = vpack.c.bf16 %v1762_v63, %v1754_v21  ;;  %v1411_v41 = vpop.f32.mrb[96].mxu0 }
 0x1f5   : > { %v1876_v29 = vpack.c.bf16 %v1764_v7, %v1756_v33  ;;  %v1412_v24 = vadd.f32 %v1411_v41, %v3928_v42  ;;  %v1572_v45 = vpop.f32.mrb[96].mxu1  ;;  %v1413_v34 = vpop.f32.mrb[97].mxu0 }
 0x1f6   : > { %v1573_v37 = vadd.f32 %v1572_v45, %v3928_v42  ;;  %v1414_v38 = vadd.f32 %v1413_v34, %v3928_v42  ;;  %v1574_v4 = vpop.f32.mrb[97].mxu1  ;;  %v1415_v39 = vpop.f32.mrb[98].mxu0  ;;  %2175 = vmatprep.subr.bf16.mxu0 %v1874_v50 }
 0x1f7   : > { %v1575_v55 = vadd.f32 %v1574_v4, %v3928_v42  ;;  %v1416_v40 = vadd.f32 %v1415_v39, %v3930_v48  ;;  %v1576_v22 = vpop.f32.mrb[98].mxu1  ;;  %2246 = vmatprep.subr.bf16.mxu1 %v1876_v29  ;;  %v1417_v62 = vpop.f32.mrb[99].mxu0  ;;  %2176 = vmatpush1.bf16.msra.mxu0 %v1873_v1  ;;  %v1769_v49 = vmax.f32 %v1412_v24, 0.0 }
 0x1f8   : > { %v1577_v44 = vadd.f32 %v1576_v22, %v3930_v48  ;;  %v1418_v47 = vadd.f32 %v1417_v62, %v3930_v48  ;;  %v1578_v61 = vpop.f32.mrb[99].mxu1  ;;  %2247 = vmatpush1.bf16.msra.mxu1 %v1875_v26  ;;  %v1771_v19 = vmax.f32 %v1573_v37, 0.0  ;;  %v1770_v51 = vmax.f32 %v1414_v38, 0.0 }
 0x1f9   : > { %v1777_v17 = vmax.f32 %v1416_v40, 0.0  ;;  %v1579_v35 = vadd.f32 %v1578_v61, %v3930_v48  ;;  %v1772_v57 = vmax.f32 %v1575_v55, 0.0 }
 0x1fa   : > { %v1779_v54 = vmax.f32 %v1577_v44, 0.0  ;;  %v1778_v42 = vmax.f32 %v1418_v47, 0.0 }
 0x1fb   : > { %v1881_v58 = vpack.c.bf16 %v1777_v17, %v1769_v49  ;;  %v1780_v59 = vmax.f32 %v1579_v35, 0.0 }
 0x1fc   : > { %v1883_v60 = vpack.c.bf16 %v1779_v54, %v1771_v19  ;;  %v1882_v8 = vpack.c.bf16 %v1778_v42, %v1770_v51  ;;  %v1421_v46 = vpop.f32.mrb[100].mxu0 }
 0x1fd   : > { %v1884_v0 = vpack.c.bf16 %v1780_v59, %v1772_v57  ;;  %v1422_v2 = vadd.f32 %v1421_v46, %v3940_v31  ;;  %v1582_v5 = vpop.f32.mrb[100].mxu1  ;;  %v1423_v6 = vpop.f32.mrb[101].mxu0 }
 0x1fe   : > { %v1583_v27 = vadd.f32 %v1582_v5, %v3940_v31  ;;  %v1424_v25 = vadd.f32 %v1423_v6, %v3940_v31  ;;  %v1584_v48 = vpop.f32.mrb[101].mxu1  ;;  %v1425_v28 = vpop.f32.mrb[102].mxu0  ;;  %2177 = vmatprep.subr.bf16.mxu0 %v1882_v8 }
 0x1ff   : > { %v1785_v9 = vmax.f32 %v1422_v2, 0.0  ;;  %v1585_v10 = vadd.f32 %v1584_v48, %v3940_v31  ;;  %v1586_v11 = vpop.f32.mrb[102].mxu1  ;;  %2248 = vmatprep.subr.bf16.mxu1 %v1884_v0  ;;  %v1426_v13 = vpop.f32.mrb[103].mxu0  ;;  %2178 = vmatpush1.bf16.msra.mxu0 %v1881_v58 }
 0x200   : > { %v1787_v14 = vmax.f32 %v1583_v27, 0.0  ;;  %v1786_v56 = vmax.f32 %v1424_v25, 0.0  ;;  %v1587_v15 = vpop.f32.mrb[103].mxu1  ;;  %2249 = vmatpush1.bf16.msra.mxu1 %v1883_v60  ;;  %v4133_v31 = vpop.permute.xlu0 %1914 }
 0x201   : > { %v1889_v36 = vpack.c.bf16 %v1785_v9, %v1785_v9  ;;  %v1788_v16 = vmax.f32 %v1585_v10, 0.0 }
 0x202   : > { %v1891_v20 = vpack.c.bf16 %v1787_v14, %v1787_v14  ;;  %v1890_v21 = vpack.c.bf16 %v1786_v56, %v1786_v56 }
 0x203   : > { %v1892_v23 = vpack.c.bf16 %v1788_v16, %v1788_v16  ;;  %v2002_v63 = vsel %vm1988_vm2, %v1889_v36, 0 }
 0x204   : > { %2812 = vmatprep.subr.msk.bf16.mxu0 %vm1988_vm2, %v1890_v21  ;;  %v2008_v33 = vsel %vm1988_vm2, %v1891_v20, 0  ;;  %v4145_v62 = vpop.permute.xlu0 %1924 }
 0x205   : > { %2817 = vmatprep.subr.msk.bf16.mxu1 %vm1988_vm2, %v1892_v23  ;;  %2180 = vmatpush1.bf16.msra.mxu0 %v2002_v63 }
 0x206   : > { %2251 = vmatpush1.bf16.msra.mxu1 %v2008_v33 }
 0x208   : > { %2188 = vmatmul.mubr.bf16.vlgmr.msra.gmra.mrb[120].mxu0 %v3952_v12  ;;  %v4157_v56 = vpop.permute.xlu0 %1934 }
 0x209   : > { %2259 = vmatmul.mubr.bf16.vlgmr.msra.gmra.mrb[120].mxu1 %v3952_v12  ;;  %2814 = vmatprep.mubr.msk.bf16.mxu0 %vm1975_vm1, %v3959_v18  ;;  %v4135_v12 = vpop.permute.xlu1 %1909 }
 0x20a   : > { %2819 = vmatprep.mubr.msk.bf16.mxu1 %vm1975_vm1, %v3959_v18 }
 0x20d   : > { %v4147_v49 = vpop.permute.xlu1 %1919 }
 0x210   : > { %2198 = vmatmul.mubr.bf16.gmra.mrb[124].mxu0 %v3977_v52 }
 0x211   : > { %2269 = vmatmul.mubr.bf16.gmra.mrb[124].mxu1 %v3977_v52  ;;  %2815 = vmatprep.mubr.msk.bf16.mxu0 %vm1975_vm1, %v3983_v3  ;;  %v4159_v20 = vpop.permute.xlu1 %1929 }
 0x212   : > { %2820 = vmatprep.mubr.msk.bf16.mxu1 %vm1975_vm1, %v3983_v3 }
 0x218   : > { %2208 = vmatmul.mubr.bf16.gmra.mrb[128].mxu0 %v4004_v43 }
 0x219   : > { %2279 = vmatmul.mubr.bf16.gmra.mrb[128].mxu1 %v4004_v43  ;;  %2816 = vmatprep.mubr.msk.bf16.mxu0 %vm1975_vm1, %v4007_v53 }
 0x21a   : > { %2821 = vmatprep.mubr.msk.bf16.mxu1 %vm1975_vm1, %v4007_v53 }
 0x220   : > { %2218 = vmatmul.mubr.bf16.gmra.mrb[132].mxu0 %v4022_v32 }
 0x221   : > { %2289 = vmatmul.mubr.bf16.gmra.mrb[132].mxu1 %v4022_v32  ;;  %2457 = vmatprep.mubr.bf16.mxu0 %v3168_v30 }
 0x222   : > { %2498 = vmatprep.mubr.bf16.mxu1 %v3168_v30 }
 0x273   : > { %v2047_v18 = vpop.f32.mrb[104].mxu0 }
 0x274   : > { %v2048_v52 = vadd.f32 %v2047_v18, %v4135_v12  ;;  %v2118_v3 = vpop.f32.mrb[104].mxu1  ;;  %v2049_v43 = vpop.f32.mrb[105].mxu0 }
 0x275   : > { %v2119_v1 = vadd.f32 %v2118_v3, %v4135_v12  ;;  %v2050_v53 = vadd.f32 %v2049_v43, %v4135_v12  ;;  %v2120_v7 = vpop.f32.mrb[105].mxu1  ;;  %v2051_v26 = vpop.f32.mrb[106].mxu0 }
 0x276   : > { %v2121_v32 = vadd.f32 %v2120_v7, %v4135_v12  ;;  %v2052_v50 = vadd.f32 %v2051_v26, %v4133_v31  ;;  %v2122_v41 = vpop.f32.mrb[106].mxu1  ;;  %v2053_v29 = vpop.f32.mrb[107].mxu0  ;;  %v2297_v37 = vmax.f32 %v2048_v52, 0.0 }
 0x277   : > { %v2123_v24 = vadd.f32 %v2122_v41, %v4133_v31  ;;  %v2054_v45 = vadd.f32 %v2053_v29, %v4133_v31  ;;  %v2124_v34 = vpop.f32.mrb[107].mxu1  ;;  %v2299_v39 = vmax.f32 %v2119_v1, 0.0  ;;  %v2298_v55 = vmax.f32 %v2050_v53, 0.0 }
 0x278   : > { %v2305_v38 = vmax.f32 %v2052_v50, 0.0  ;;  %v2125_v4 = vadd.f32 %v2124_v34, %v4133_v31  ;;  %v2300_v44 = vmax.f32 %v2121_v32, 0.0 }
 0x279   : > { %v2307_v40 = vmax.f32 %v2123_v24, 0.0  ;;  %v2306_v22 = vmax.f32 %v2054_v45, 0.0 }
 0x27a   : > { %v2353_v47 = vpack.c.bf16 %v2305_v38, %v2297_v37  ;;  %v2308_v61 = vmax.f32 %v2125_v4, 0.0 }
 0x27b   : > { %v2355_v17 = vpack.c.bf16 %v2307_v40, %v2299_v39  ;;  %v2354_v35 = vpack.c.bf16 %v2306_v22, %v2298_v55  ;;  %v2057_v19 = vpop.f32.mrb[108].mxu0 }
 0x27c   : > { %v2356_v51 = vpack.c.bf16 %v2308_v61, %v2300_v44  ;;  %v2058_v54 = vadd.f32 %v2057_v19, %v4147_v49  ;;  %v2128_v42 = vpop.f32.mrb[108].mxu1  ;;  %v2059_v57 = vpop.f32.mrb[109].mxu0 }
 0x27d   : > { %v2129_v58 = vadd.f32 %v2128_v42, %v4147_v49  ;;  %v2060_v59 = vadd.f32 %v2059_v57, %v4147_v49  ;;  %v2130_v60 = vpop.f32.mrb[109].mxu1  ;;  %v2061_v8 = vpop.f32.mrb[110].mxu0  ;;  %2425 = vmatprep.subr.bf16.mxu0 %v2354_v35 }
 0x27e   : > { %v2131_v46 = vadd.f32 %v2130_v60, %v4147_v49  ;;  %v2062_v0 = vadd.f32 %v2061_v8, %v4145_v62  ;;  %v2132_v2 = vpop.f32.mrb[110].mxu1  ;;  %2466 = vmatprep.subr.bf16.mxu1 %v2356_v51  ;;  %v2063_v5 = vpop.f32.mrb[111].mxu0  ;;  %2426 = vmatpush1.bf16.msra.mxu0 %v2353_v47  ;;  %v2313_v48 = vmax.f32 %v2058_v54, 0.0 }
 0x27f   : > { %v2133_v6 = vadd.f32 %v2132_v2, %v4145_v62  ;;  %v2064_v27 = vadd.f32 %v2063_v5, %v4145_v62  ;;  %v2134_v25 = vpop.f32.mrb[111].mxu1  ;;  %2467 = vmatpush1.bf16.msra.mxu1 %v2355_v17  ;;  %v2315_v10 = vmax.f32 %v2129_v58, 0.0  ;;  %v2314_v11 = vmax.f32 %v2060_v59, 0.0  ;;  %v4169_v61 = vpop.permute.xlu1 %1939 }
 0x280   : > { %v2321_v28 = vmax.f32 %v2062_v0, 0.0  ;;  %v2135_v9 = vadd.f32 %v2134_v25, %v4145_v62  ;;  %v2316_v15 = vmax.f32 %v2131_v46, 0.0 }
 0x281   : > { %v2323_v13 = vmax.f32 %v2133_v6, 0.0  ;;  %v2322_v14 = vmax.f32 %v2064_v27, 0.0 }
 0x282   : > { %v2361_v36 = vpack.c.bf16 %v2321_v28, %v2313_v48  ;;  %v2324_v16 = vmax.f32 %v2135_v9, 0.0 }
 0x283   : > { %v2363_v21 = vpack.c.bf16 %v2323_v13, %v2315_v10  ;;  %v2362_v23 = vpack.c.bf16 %v2322_v14, %v2314_v11  ;;  %v2067_v63 = vpop.f32.mrb[112].mxu0 }
 0x284   : > { %v2364_v33 = vpack.c.bf16 %v2324_v16, %v2316_v15  ;;  %v2068_v18 = vadd.f32 %v2067_v63, %v4159_v20  ;;  %v2138_v52 = vpop.f32.mrb[112].mxu1  ;;  %v2069_v3 = vpop.f32.mrb[113].mxu0  ;;  %v4182_v15 = vld [vmem:[%s4278_s5] sm:$0x1] }
 0x285   : > { %v2139_v43 = vadd.f32 %v2138_v52, %v4159_v20  ;;  %v2070_v1 = vadd.f32 %v2069_v3, %v4159_v20  ;;  %v2140_v53 = vpop.f32.mrb[113].mxu1  ;;  %v2071_v7 = vpop.f32.mrb[114].mxu0  ;;  %2427 = vmatprep.subr.bf16.mxu0 %v2362_v23 }
 0x286   : > { %v2141_v26 = vadd.f32 %v2140_v53, %v4159_v20  ;;  %v2072_v32 = vadd.f32 %v2071_v7, %v4157_v56  ;;  %v2142_v50 = vpop.f32.mrb[114].mxu1  ;;  %2468 = vmatprep.subr.bf16.mxu1 %v2364_v33  ;;  %v2073_v41 = vpop.f32.mrb[115].mxu0  ;;  %2428 = vmatpush1.bf16.msra.mxu0 %v2361_v36  ;;  %v2329_v34 = vmax.f32 %v2068_v18, 0.0 }
 0x287   : > { %v2143_v29 = vadd.f32 %v2142_v50, %v4157_v56  ;;  %v2074_v24 = vadd.f32 %v2073_v41, %v4157_v56  ;;  %v2144_v45 = vpop.f32.mrb[115].mxu1  ;;  %2469 = vmatpush1.bf16.msra.mxu1 %v2363_v21  ;;  %v2331_v4 = vmax.f32 %v2139_v43, 0.0  ;;  %v2330_v39 = vmax.f32 %v2070_v1, 0.0 }
 0x288   : > { %v2337_v37 = vmax.f32 %v2072_v32, 0.0  ;;  %v2145_v38 = vadd.f32 %v2144_v45, %v4157_v56  ;;  %v2332_v22 = vmax.f32 %v2141_v26, 0.0 }
 0x289   : > { %v2339_v55 = vmax.f32 %v2143_v29, 0.0  ;;  %v2338_v40 = vmax.f32 %v2074_v24, 0.0 }
 0x28a   : > { %v2369_v44 = vpack.c.bf16 %v2337_v37, %v2329_v34  ;;  %v2340_v47 = vmax.f32 %v2145_v38, 0.0 }
 0x28b   : > { %v2371_v17 = vpack.c.bf16 %v2339_v55, %v2331_v4  ;;  %v2370_v35 = vpack.c.bf16 %v2338_v40, %v2330_v39  ;;  %v2077_v19 = vpop.f32.mrb[116].mxu0 }
 0x28c   : > { %v2372_v51 = vpack.c.bf16 %v2340_v47, %v2332_v22  ;;  %v2078_v54 = vadd.f32 %v2077_v19, %v4169_v61  ;;  %v2148_v42 = vpop.f32.mrb[116].mxu1  ;;  %v2079_v57 = vpop.f32.mrb[117].mxu0 }
 0x28d   : > { %v2149_v58 = vadd.f32 %v2148_v42, %v4169_v61  ;;  %v2080_v59 = vadd.f32 %v2079_v57, %v4169_v61  ;;  %v2150_v60 = vpop.f32.mrb[117].mxu1  ;;  %2429 = vmatprep.subr.bf16.mxu0 %v2370_v35  ;;  %v2081_v8 = vpop.f32.mrb[118].mxu0 }
 0x28e   : > { %v2345_v46 = vmax.f32 %v2078_v54, 0.0  ;;  %v2151_v0 = vadd.f32 %v2150_v60, %v4169_v61  ;;  %2470 = vmatprep.subr.bf16.mxu1 %v2372_v51  ;;  %2430 = vmatpush1.bf16.msra.mxu0 %v2369_v44  ;;  %v2152_v2 = vpop.f32.mrb[118].mxu1  ;;  %v2082_v5 = vpop.f32.mrb[119].mxu0 }
 0x28f   : > { %v2347_v6 = vmax.f32 %v2149_v58, 0.0  ;;  %v2346_v27 = vmax.f32 %v2080_v59, 0.0  ;;  %2471 = vmatpush1.bf16.msra.mxu1 %v2371_v17  ;;  %v2153_v25 = vpop.f32.mrb[119].mxu1 }
 0x290   : > { %v2377_v48 = vpack.c.bf16 %v2345_v46, %v2345_v46  ;;  %v2348_v28 = vmax.f32 %v2151_v0, 0.0 }
 0x291   : > { %v2379_v9 = vpack.c.bf16 %v2347_v6, %v2347_v6  ;;  %v2378_v10 = vpack.c.bf16 %v2346_v27, %v2346_v27 }
 0x292   : > { %v2380_v11 = vpack.c.bf16 %v2348_v28, %v2348_v28  ;;  %v2402_v13 = vsel %vm2400_vm3, %v2377_v48, 0 }
 0x293   : > { %2822 = vmatprep.subr.msk.bf16.mxu0 %vm2400_vm3, %v2378_v10  ;;  %v2408_v14 = vsel %vm2400_vm3, %v2379_v9, 0 }
 0x294   : > { %2824 = vmatprep.subr.msk.bf16.mxu1 %vm2400_vm3, %v2380_v11  ;;  %2432 = vmatpush1.bf16.msra.mxu0 %v2402_v13 }
 0x295   : > { %2473 = vmatpush1.bf16.msra.mxu1 %v2408_v14 }
 0x297   : > { %2823 = vmatmul.mubr.msk.bf16.vlgmr.msra.gmra.mrb[136].mxu0 %vm2396_vm4, %v4182_v15 }
 0x298   : > { %2825 = vmatmul.mubr.msk.bf16.vlgmr.msra.gmra.mrb[136].mxu1 %vm2396_vm4, %v4182_v15  ;;  %2539 = vmatprep.mubr.bf16.mxu0 %v3168_v30 }
 0x299   : > { %2580 = vmatprep.mubr.bf16.mxu1 %v3168_v30 }
 0x2db   : > { %v2189_v36 = vpop.f32.mrb[120].mxu0 }
 0x2dc   : > { %v2190_v16 = vadd.f32 %v2189_v36, %v4135_v12  ;;  %v2260_v21 = vpop.f32.mrb[120].mxu1  ;;  %v2191_v23 = vpop.f32.mrb[121].mxu0 }
 0x2dd   : > { %v2261_v63 = vadd.f32 %v2260_v21, %v4135_v12  ;;  %v2192_v33 = vadd.f32 %v2191_v23, %v4135_v12  ;;  %v2262_v18 = vpop.f32.mrb[121].mxu1  ;;  %v2193_v52 = vpop.f32.mrb[122].mxu0 }
 0x2de   : > { %v2263_v3 = vadd.f32 %v2262_v18, %v4135_v12  ;;  %v2194_v43 = vadd.f32 %v2193_v52, %v4133_v31  ;;  %v2264_v1 = vpop.f32.mrb[122].mxu1  ;;  %v2195_v53 = vpop.f32.mrb[123].mxu0  ;;  %v2301_v32 = vmax.f32 %v2190_v16, 0.0 }
 0x2df   : > { %v2265_v7 = vadd.f32 %v2264_v1, %v4133_v31  ;;  %v2196_v30 = vadd.f32 %v2195_v53, %v4133_v31  ;;  %v2266_v26 = vpop.f32.mrb[123].mxu1  ;;  %v2303_v29 = vmax.f32 %v2261_v63, 0.0  ;;  %v2302_v24 = vmax.f32 %v2192_v33, 0.0 }
 0x2e0   : > { %v2309_v50 = vmax.f32 %v2194_v43, 0.0  ;;  %v2267_v41 = vadd.f32 %v2266_v26, %v4133_v31  ;;  %v2304_v37 = vmax.f32 %v2263_v3, 0.0 }
 0x2e1   : > { %v2311_v45 = vmax.f32 %v2265_v7, 0.0  ;;  %v2310_v34 = vmax.f32 %v2196_v30, 0.0 }
 0x2e2   : > { %v2357_v38 = vpack.c.bf16 %v2309_v50, %v2301_v32  ;;  %v2312_v12 = vmax.f32 %v2267_v41, 0.0 }
 0x2e3   : > { %v2359_v4 = vpack.c.bf16 %v2311_v45, %v2303_v29  ;;  %v2358_v39 = vpack.c.bf16 %v2310_v34, %v2302_v24  ;;  %v2199_v55 = vpop.f32.mrb[124].mxu0 }
 0x2e4   : > { %v2360_v40 = vpack.c.bf16 %v2312_v12, %v2304_v37  ;;  %v2200_v22 = vadd.f32 %v2199_v55, %v4147_v49  ;;  %v2270_v44 = vpop.f32.mrb[124].mxu1  ;;  %v2201_v47 = vpop.f32.mrb[125].mxu0 }
 0x2e5   : > { %v2271_v17 = vadd.f32 %v2270_v44, %v4147_v49  ;;  %v2202_v35 = vadd.f32 %v2201_v47, %v4147_v49  ;;  %v2272_v31 = vpop.f32.mrb[125].mxu1  ;;  %v2203_v19 = vpop.f32.mrb[126].mxu0  ;;  %2507 = vmatprep.subr.bf16.mxu0 %v2358_v39 }
 0x2e6   : > { %v2273_v51 = vadd.f32 %v2272_v31, %v4147_v49  ;;  %v2204_v54 = vadd.f32 %v2203_v19, %v4145_v62  ;;  %v2274_v42 = vpop.f32.mrb[126].mxu1  ;;  %2548 = vmatprep.subr.bf16.mxu1 %v2360_v40  ;;  %v2205_v57 = vpop.f32.mrb[127].mxu0  ;;  %2508 = vmatpush1.bf16.msra.mxu0 %v2357_v38  ;;  %v2317_v8 = vmax.f32 %v2200_v22, 0.0 }
 0x2e7   : > { %v2275_v58 = vadd.f32 %v2274_v42, %v4145_v62  ;;  %v2206_v59 = vadd.f32 %v2205_v57, %v4145_v62  ;;  %v2276_v60 = vpop.f32.mrb[127].mxu1  ;;  %2549 = vmatpush1.bf16.msra.mxu1 %v2359_v4  ;;  %v2319_v2 = vmax.f32 %v2271_v17, 0.0  ;;  %v2318_v5 = vmax.f32 %v2202_v35, 0.0 }
 0x2e8   : > { %v2325_v46 = vmax.f32 %v2204_v54, 0.0  ;;  %v2277_v0 = vadd.f32 %v2276_v60, %v4145_v62  ;;  %v2320_v27 = vmax.f32 %v2273_v51, 0.0 }
 0x2e9   : > { %v2327_v6 = vmax.f32 %v2275_v58, 0.0  ;;  %v2326_v49 = vmax.f32 %v2206_v59, 0.0 }
 0x2ea   : > { %v2365_v25 = vpack.c.bf16 %v2325_v46, %v2317_v8  ;;  %v2328_v48 = vmax.f32 %v2277_v0, 0.0  ;;  %v3169_v0 = vmov 1966171168  }
 0x2eb   : > { %v2367_v28 = vpack.c.bf16 %v2327_v6, %v2319_v2  ;;  %v2366_v9 = vpack.c.bf16 %v2326_v49, %v2318_v5  ;;  %v2209_v10 = vpop.f32.mrb[128].mxu0  ;;  %v2602_v2 = vunpack.c.l.s4 %v3169_v0  ;;  %v2390_v6 = vpop.permute.xlu0 %2389 }
 0x2ec   : > { %v2368_v11 = vpack.c.bf16 %v2328_v48, %v2320_v27  ;;  %v2210_v13 = vadd.f32 %v2209_v10, %v4159_v20  ;;  %v2280_v14 = vpop.f32.mrb[128].mxu1  ;;  %v2211_v36 = vpop.f32.mrb[129].mxu0 }
 0x2ed   : > { %v2281_v16 = vadd.f32 %v2280_v14, %v4159_v20  ;;  %v2212_v21 = vadd.f32 %v2211_v36, %v4159_v20  ;;  %v2282_v62 = vpop.f32.mrb[129].mxu1  ;;  %v2213_v23 = vpop.f32.mrb[130].mxu0  ;;  %2509 = vmatprep.subr.bf16.mxu0 %v2366_v9  ;;  %v2603_v49 = vunpack.c.0.s8 %v2602_v2 }
 0x2ee   : > { %v2283_v63 = vadd.f32 %v2282_v62, %v4159_v20  ;;  %v2214_v33 = vadd.f32 %v2213_v23, %v4157_v56  ;;  %v2284_v18 = vpop.f32.mrb[130].mxu1  ;;  %2550 = vmatprep.subr.bf16.mxu1 %v2368_v11  ;;  %v2215_v52 = vpop.f32.mrb[131].mxu0  ;;  %2510 = vmatpush1.bf16.msra.mxu0 %v2365_v25  ;;  %v2333_v53 = vmax.f32 %v2210_v13, 0.0 }
 0x2ef   : > { %v2285_v3 = vadd.f32 %v2284_v18, %v4157_v56  ;;  %v2216_v43 = vadd.f32 %v2215_v52, %v4157_v56  ;;  %v2286_v1 = vpop.f32.mrb[131].mxu1  ;;  %2551 = vmatpush1.bf16.msra.mxu1 %v2367_v28  ;;  %v2335_v26 = vmax.f32 %v2281_v16, 0.0  ;;  %v2334_v32 = vmax.f32 %v2212_v21, 0.0 }
 0x2f0   : > { %v2341_v7 = vmax.f32 %v2214_v33, 0.0  ;;  %v2287_v30 = vadd.f32 %v2286_v1, %v4157_v56  ;;  %v2336_v41 = vmax.f32 %v2283_v63, 0.0 }
 0x2f1   : > { %v2343_v50 = vmax.f32 %v2285_v3, 0.0  ;;  %v2342_v20 = vmax.f32 %v2216_v43, 0.0 }
 0x2f2   : > { %v2373_v29 = vpack.c.bf16 %v2341_v7, %v2333_v53  ;;  %v2344_v24 = vmax.f32 %v2287_v30, 0.0 }
 0x2f3   : > { %v2375_v45 = vpack.c.bf16 %v2343_v50, %v2335_v26  ;;  %v2374_v34 = vpack.c.bf16 %v2342_v20, %v2334_v32  ;;  %v2219_v37 = vpop.f32.mrb[132].mxu0 }
 0x2f4   : > { %v2376_v38 = vpack.c.bf16 %v2344_v24, %v2336_v41  ;;  %v2220_v12 = vadd.f32 %v2219_v37, %v4169_v61  ;;  %v2290_v4 = vpop.f32.mrb[132].mxu1  ;;  %v2221_v39 = vpop.f32.mrb[133].mxu0 }
 0x2f5   : > { %v2291_v55 = vadd.f32 %v2290_v4, %v4169_v61  ;;  %v2222_v40 = vadd.f32 %v2221_v39, %v4169_v61  ;;  %v2292_v56 = vpop.f32.mrb[133].mxu1  ;;  %v2223_v22 = vpop.f32.mrb[134].mxu0  ;;  %2511 = vmatprep.subr.bf16.mxu0 %v2374_v34 }
 0x2f6   : > { %v2349_v44 = vmax.f32 %v2220_v12, 0.0  ;;  %v2293_v47 = vadd.f32 %v2292_v56, %v4169_v61  ;;  %v2294_v17 = vpop.f32.mrb[134].mxu1  ;;  %2552 = vmatprep.subr.bf16.mxu1 %v2376_v38  ;;  %v2224_v35 = vpop.f32.mrb[135].mxu0  ;;  %2512 = vmatpush1.bf16.msra.mxu0 %v2373_v29  ;;  %v2392_v61 = vlaneseq }
 0x2f7   : > { %v2351_v31 = vmax.f32 %v2291_v55, 0.0  ;;  %v2350_v19 = vmax.f32 %v2222_v40, 0.0  ;;  %v2295_v51 = vpop.f32.mrb[135].mxu1  ;;  %2553 = vmatpush1.bf16.msra.mxu1 %v2375_v45 }
 0x2f8   : > { %v2381_v54 = vpack.c.bf16 %v2349_v44, %v2349_v44  ;;  %v2352_v42 = vmax.f32 %v2293_v47, 0.0  ;;  %v2393_v46 = vshrl.u32 %v2392_v61, 7 }
 0x2f9   : > { %v2383_v57 = vpack.c.bf16 %v2351_v31, %v2351_v31  ;;  %v2382_v58 = vpack.c.bf16 %v2350_v19, %v2350_v19 }
 0x2fa   : > { %v2384_v59 = vpack.c.bf16 %v2352_v42, %v2352_v42  ;;  %v2414_v60 = vsel %vm2400_vm3, %v2381_v54, 0  ;;  %v2394_v5 = vsub.s32 0, %v2393_v46  ;;  %v2606_v10 = vsub.s32 %v2603_v49, %v2393_v46 }
 0x2fb   : > { %2826 = vmatprep.subr.msk.bf16.mxu0 %vm2400_vm3, %v2382_v58  ;;  %v2420_v8 = vsel %vm2400_vm3, %v2383_v57, 0 }
 0x2fc   : > { %2828 = vmatprep.subr.msk.bf16.mxu1 %vm2400_vm3, %v2384_v59  ;;  %2514 = vmatpush1.bf16.msra.mxu0 %v2414_v60  ;;  %v2395_v27 = vrot.slane %v2390_v6, %v2394_v5 }
 0x2fd   : > { %2555 = vmatpush1.bf16.msra.mxu1 %v2420_v8 }
 0x2ff   : > { %2827 = vmatmul.mubr.msk.bf16.vlgmr.msra.gmra.mrb[140].mxu0 %vm2396_vm4, %v4182_v15 }
 0x300   : > { %2829 = vmatmul.mubr.msk.bf16.vlgmr.msra.gmra.mrb[140].mxu1 %vm2396_vm4, %v4182_v15 }
 0x36a   : > { %v2459_v25 = vpop.f32.mrb[136].mxu0 }
 0x36b   : > { %v2460_v48 = vadd.f32 %v2459_v25, %v2395_v27  ;;  %v2500_v28 = vpop.f32.mrb[136].mxu1  ;;  %v2461_v9 = vpop.f32.mrb[137].mxu0 }
 0x36c   : > { %v2501_v11 = vadd.f32 %v2500_v28, %v2395_v27  ;;  %v2462_v13 = vadd.f32 %v2461_v9, %v2395_v27  ;;  %v2502_v14 = vpop.f32.mrb[137].mxu1  ;;  %v2463_v36 = vpop.f32.mrb[138].mxu0 }
 0x36d   : > { %v2503_v16 = vadd.f32 %v2502_v14, %v2395_v27  ;;  %v2504_v15 = vpop.f32.mrb[138].mxu1  ;;  %v2464_v21 = vpop.f32.mrb[139].mxu0 }
 0x36e   : > { %v2597_v62 = vcombine.low %v2460_v48, %v2462_v13  ;;  %v2505_v23 = vpop.f32.mrb[139].mxu1 }
 0x36f   : > { %v2598_v63 = vcombine.low %v2501_v11, %v2503_v16 }
 0x370   : > { %v2607_v33 = vrot.slane %v2597_v62, %v2606_v10 }
 0x371   : > { %v2614_v18 = vrot.slane %v2598_v63, %v2606_v10 }
 0x373   : > { %v2629_v52 = vcombine.low %v2607_v33, %v2614_v18 }
 0x375   : > { %v2637_v12 = vrot.slane %v2629_v52, %v2606_v10 }
 0x3d2   : > { %v2541_v3 = vpop.f32.mrb[140].mxu0 }
 0x3d3   : > { %v2542_v43 = vadd.f32 %v2541_v3, %v2395_v27  ;;  %v2582_v1 = vpop.f32.mrb[140].mxu1  ;;  %v2543_v53 = vpop.f32.mrb[141].mxu0 }
 0x3d4   : > { %v2583_v7 = vadd.f32 %v2582_v1, %v2395_v27  ;;  %v2544_v30 = vadd.f32 %v2543_v53, %v2395_v27  ;;  %v2584_v26 = vpop.f32.mrb[141].mxu1  ;;  %v2545_v32 = vpop.f32.mrb[142].mxu0 }
 0x3d5   : > { %v2585_v50 = vadd.f32 %v2584_v26, %v2395_v27  ;;  %v2586_v20 = vpop.f32.mrb[142].mxu1  ;;  %v2546_v41 = vpop.f32.mrb[143].mxu0 }
 0x3d6   : > { %v2599_v29 = vcombine.low %v2542_v43, %v2544_v30  ;;  %v2587_v24 = vpop.f32.mrb[143].mxu1 }
 0x3d7   : > { %v2600_v45 = vcombine.low %v2583_v7, %v2585_v50 }
 0x3d8   : > { %v2621_v34 = vrot.slane %v2599_v29, %v2606_v10 }
 0x3d9   : > { %v2628_v37 = vrot.slane %v2600_v45, %v2606_v10 }
 0x3db   : > { %v2630_v38 = vcombine.low %v2621_v34, %v2628_v37 }
 0x3dd   : > { %v2644_v4 = vrot.slane %v2630_v38, %v2606_v10 }
 0x3df   : > { %v2645_v39 = vcombine.low %v2637_v12, %v2644_v4 }
 0x3e1   : > { %2647 = vst [vmem:[%s274_s15] sm:$0xff] %v2645_v39 }
 0x3e2   : > { %3117 = shalt.err (!%p3114_p3)
}
 0x3e3   : > { %s3118_s14 = scalar_lea.hbm %s4231_s18, 128  ;;  %s3122_s30 = scalar_lea.hbm %s4280_s7, 256 }
 0x3e4   : > { %p3119_p4 = scmp.ne.s32.totalorder %s4231_s18, %s3118_s14  ;;  %p3123_p9 = scmp.lt.u32.totalorder %s4231_s18, %s4280_s7 }
 0x3e5   : > { %p3124_p10 = scmp.lt.u32.totalorder %s3122_s30, %s3118_s14  ;;  %p3126_p12 = scmp.lt.u32.totalorder %s3118_s14, %s4231_s18 }
 0x3e6   : > { %p3120_p7 = pnand %p3119_p4, %p3249_p5 }
 0x3e7   : > { %p3125_p11 = por %p3124_p10, %p3123_p9 }
 0x3e8   : > { %p3121_p8 = pneg %p3120_p7 }
 0x3e9   : > { %p3127_p13 = por %p3126_p12, %p3125_p11 }
 0x3eb   : > { %p3128_p0 = pnand %p3127_p13, %p3121_p8 }
 0x3ed   : > { %3131 = shalt.err (!%p3128_p0)
}
 0x3ee   : > { %3036 = dma.vmem_to_hbm [thread:$0]  (%p3249_p5), %s4233_s16, 128, %s4231_s18, %s2649_s19  }
 0x3ef PF: > { %p3042_p1 = scmp.ge.s32.totalorder %s3166_s29, 2  ;;  %s2675_s15 = sand.u32 1, %s3154_s26  }
 0x3f0   : > { %s2676_s21 = scalar_lea.sflag [#allocation4], %s2675_s15 }
 0x3f1   : > { %p3039_p2 = pnand %p3042_p1, %p3253_p6 }
 0x3f3   : > { %3149 = dma.done.wait (!%p3039_p2), %s2676_s21, 128  }
 0x3f4   : > { %3151 = vsyncadd (!%p3039_p2), %s2676_s21, 4294967168  ;;  %p19_p3 = scmp.ge.s32.totalorder %s3237_s8, 4   ;;  %s4283_s26 = smov %s3158_s27 }
 0x3f5   : > { %s4284_s27 = smov %s3162_s28  ;;  %s4285_s28 = smov %s3247_s11 }
 0x3f6   : > { %s4286_s29 = smov %s3237_s8  ;;  %21 = sbr.rel (!%p19_p3) target bundleno = 6 (0x6), region = 83 }
 0x3fd   :  { %2681 = vsyncpa [#allocation4], 1 }
 0x3fe   :  { %2683 = vsyncpa [#allocation4 + $0x1], 1 }

</bundles_post_ra>
